<compile_context>
chip_gen: v5e
topology: v5e:2x2
jax: 0.10.0
libtpu: 0.0.40
codegen_flags: <defaults>
</compile_context>

<pallas_src>
import jax
import jax.numpy as jnp
from jax.experimental import pallas as pl
from jax.experimental.pallas import tpu as pltpu

DIM = 32           # GRU hidden size == embedding dim
OUT = 32           # output_size
VOCAB = 16         # embedding table rows
DEFAULT_CHUNK = 32 # time steps per grid step (tunable; 32-256 all work)


def _round_up(n, m):
    return ((n + m - 1) // m) * m


def _make_kernel(T, CHUNK):
    """Build the chunked kernel body (T, CHUNK are static)."""
    K = 3 * DIM          # gate lanes driven by h (and by x)
    W = K + OUT          # gates + folded output projection
    needs_mask = (T % CHUNK) != 0

    def kernel(x_ref,                    # (CHUNK, DIM)  relu(emb[tokens]) chunk
               h0_ref,                   # (1, DIM)      initial hidden
               wih_ref, bih_ref,         # (DIM, 3*DIM), (1, 3*DIM)   input-side GRU
               whhx_ref, bhhx_ref,       # (DIM, K+OUT), (1, K+OUT)   [W_hh | W_out]
               logp_ref,                 # (CHUNK, OUT)  log-prob output chunk
               hout_ref,                 # (1, DIM)      final hidden
               h_sc, gh_sc):             # VMEM carry across chunks
        c = pl.program_id(0)

        # Hoist resident weights into registers once per chunk.
        whhx = whhx_ref[...]
        bhhx = bhhx_ref[...]

        @pl.when(c == 0)
        def _init():
            h_sc[...] = h0_ref[...]
            gh_sc[...] = jnp.dot(h0_ref[...], whhx,
                                 preferred_element_type=jnp.float32) + bhhx

        # Batched input-side projection for the whole chunk (off the serial path).
        gi_all = jnp.dot(x_ref[...], wih_ref[...],
                         preferred_element_type=jnp.float32) + bih_ref[...]

        h = h_sc[...]            # (1, DIM)        register-carried below
        gh = gh_sc[...]          # (1, K + OUT)    h @ [W_hh|W_out] + bias

        for j in range(CHUNK):   # statically unrolled recurrence
            gi = gi_all[j:j + 1, :]                       # (1, 3*DIM)
            r = jax.nn.sigmoid(gi[:, 0:DIM] + gh[:, 0:DIM])
            z = jax.nn.sigmoid(gi[:, DIM:2 * DIM] + gh[:, DIM:2 * DIM])
            n = jnp.tanh(gi[:, 2 * DIM:K] + r * gh[:, 2 * DIM:K])
            h_new = (1.0 - z) * n + z * h

            # Single serial MXU op per token: gates AND output projection of h_new.
            gh_new = jnp.dot(h_new, whhx,
                             preferred_element_type=jnp.float32) + bhhx

            if needs_mask:
                valid = (c * CHUNK + j) < T               # freeze state on pad steps
                h_new = jnp.where(valid, h_new, h)
                gh_new = jnp.where(valid, gh_new, gh)
            h, gh = h_new, gh_new

            # log-softmax over the folded projection lanes (not on the critical path).
            logits = gh[:, K:W]                           # (1, OUT)
            m = jnp.max(logits, axis=1, keepdims=True)
            lse = jnp.log(jnp.sum(jnp.exp(logits - m), axis=1, keepdims=True)) + m
            logp_ref[j:j + 1, :] = logits - lse

        # Cross-chunk carry: one VMEM round-trip per CHUNK steps, not per step.
        h_sc[...] = h
        gh_sc[...] = gh

        @pl.when(c == pl.num_programs(0) - 1)
        def _final():
            hout_ref[...] = h

    return kernel


def dyad_decoder_decode(tokens, hidden, params, *, chunk=DEFAULT_CHUNK):
    """Run the DyadDecoder forward T times, hidden state carried across steps.

    tokens: (T,) int32; hidden: (1, 1, DIM) f32.
    Returns (logps (T, OUT), hidden_final (1, 1, DIM)).
    """
    emb_table, w_ih, w_hh, b_ih, b_hh, w_out, b_out = params
    T = int(tokens.shape[0])
    if T == 0:
        return jnp.zeros((0, OUT), jnp.float32), hidden.reshape(1, 1, DIM)

    CHUNK = int(min(_round_up(chunk, 8), _round_up(T, 8)))
    num_chunks = int(pl.cdiv(T, CHUNK))
    T_pad = num_chunks * CHUNK

    # Hoisted embedding gather + ReLU (tokens known up-front -> one XLA gather).
    x_all = jnp.maximum(emb_table[tokens], 0.0)                 # (T, DIM)
    if T_pad != T:
        x_all = jnp.pad(x_all, ((0, T_pad - T), (0, 0)))

    # Hidden-side weights with the output projection folded in (one serial matmul/step).
    whh_ext = jnp.concatenate([w_hh, w_out], axis=1)            # (DIM, 3*DIM + OUT)
    bhh_ext = jnp.concatenate([b_hh, b_out], axis=1)            # (1, 3*DIM + OUT)
    h0 = hidden.reshape(1, DIM)

    grid_spec = pltpu.PrefetchScalarGridSpec(
        num_scalar_prefetch=0,
        grid=(num_chunks,),
        in_specs=[
            pl.BlockSpec((CHUNK, DIM), lambda c: (c, 0)),            # x chunk (streamed)
            pl.BlockSpec((1, DIM), lambda c: (0, 0)),                # initial hidden
            pl.BlockSpec((DIM, 3 * DIM), lambda c: (0, 0)),          # W_ih (resident)
            pl.BlockSpec((1, 3 * DIM), lambda c: (0, 0)),            # b_ih
            pl.BlockSpec((DIM, 3 * DIM + OUT), lambda c: (0, 0)),    # [W_hh | W_out]
            pl.BlockSpec((1, 3 * DIM + OUT), lambda c: (0, 0)),      # [b_hh | b_out]
        ],
        out_specs=(
            pl.BlockSpec((CHUNK, OUT), lambda c: (c, 0)),            # log-prob chunk
            pl.BlockSpec((1, DIM), lambda c: (0, 0)),                # final hidden
        ),
        scratch_shapes=[
            pltpu.VMEM((1, DIM), jnp.float32),                       # h carry (chunks)
            pltpu.VMEM((1, 3 * DIM + OUT), jnp.float32),             # gh carry (chunks)
        ],
    )

    logp_pad, h_new = pl.pallas_call(
        _make_kernel(T, CHUNK),
        grid_spec=grid_spec,
        out_shape=(
            jax.ShapeDtypeStruct((T_pad, OUT), jnp.float32),
            jax.ShapeDtypeStruct((1, DIM), jnp.float32),
        ),
        compiler_params=pltpu.CompilerParams(
            dimension_semantics=("arbitrary",)),                     # recurrent time axis
    )(x_all, h0, w_ih, b_ih, whh_ext, bhh_ext)

    return logp_pad[:T], h_new.reshape(1, 1, DIM)


dyad_decoder_decode_jit = jax.jit(dyad_decoder_decode, static_argnames=("chunk",))


def dyad_decoder_forward(token_id, hidden, params):
    """Single-step API matching the PyTorch module's forward(input, hidden)."""
    logp, h_new = dyad_decoder_decode_jit(token_id.reshape(1), hidden, params)
    return logp, h_new


def make_params(key):
    """Deterministic synthetic parameters (shapes follow nn.GRU / nn.Linear)."""
    ks = jax.random.split(key, 7)
    scale = 0.1
    emb_table = scale * jax.random.normal(ks[0], (VOCAB, DIM), jnp.float32)
    # PyTorch stores weight_ih_l0 as (3*DIM, DIM); we keep the transpose (x @ W form).
    w_ih = scale * jax.random.normal(ks[1], (DIM, 3 * DIM), jnp.float32)
    w_hh = scale * jax.random.normal(ks[2], (DIM, 3 * DIM), jnp.float32)
    b_ih = scale * jax.random.normal(ks[3], (1, 3 * DIM), jnp.float32)
    b_hh = scale * jax.random.normal(ks[4], (1, 3 * DIM), jnp.float32)
    # nn.Linear weight is (OUT, DIM); we keep the transpose.
    w_out = scale * jax.random.normal(ks[5], (DIM, OUT), jnp.float32)
    b_out = scale * jax.random.normal(ks[6], (1, OUT), jnp.float32)
    return (emb_table, w_ih, w_hh, b_ih, b_hh, w_out, b_out)


def reference_decode(tokens, hidden, params):
    """Pure-JAX reference: the PyTorch forward applied step-by-step."""
    emb_table, w_ih, w_hh, b_ih, b_hh, w_out, b_out = params
    h = hidden.reshape(1, DIM)
    logps = []
    for t in range(tokens.shape[0]):
        x = jnp.maximum(emb_table[tokens[t]].reshape(1, DIM), 0.0)
        gi = x @ w_ih + b_ih
        gh = h @ w_hh + b_hh
        r = jax.nn.sigmoid(gi[:, :DIM] + gh[:, :DIM])
        z = jax.nn.sigmoid(gi[:, DIM:2 * DIM] + gh[:, DIM:2 * DIM])
        n = jnp.tanh(gi[:, 2 * DIM:] + r * gh[:, 2 * DIM:])
        h = (1.0 - z) * n + z * h
        logits = h @ w_out + b_out
        logps.append(jax.nn.log_softmax(logits, axis=1))
    return jnp.concatenate(logps, axis=0), h.reshape(1, 1, DIM)


if __name__ == "__main__":
    key = jax.random.PRNGKey(0)
    k_par, k_tok, k_tok2 = jax.random.split(key, 3)

    params = make_params(k_par)
    hidden0 = jnp.zeros((1, 1, DIM), jnp.float32)          # initHidden()

    # --- Test 1: short sequence (single chunk, no padding) ---------------------
    T = 8
    tokens = jax.random.randint(k_tok, (T,), 0, VOCAB, dtype=jnp.int32)
    logps, h_final = dyad_decoder_decode_jit(tokens, hidden0, params)
    jax.block_until_ready((logps, h_final))

    ref_logps, ref_h = reference_decode(tokens, hidden0, params)
    assert logps.shape == (T, OUT) and h_final.shape == (1, 1, DIM)
    assert jnp.allclose(logps, ref_logps, atol=1e-5, rtol=1e-5)
    assert jnp.allclose(h_final, ref_h, atol=1e-5, rtol=1e-5)

    # --- Test 2: multi-chunk path with padding/masking in the last chunk -------
    T2 = 37
    tokens2 = jax.random.randint(k_tok2, (T2,), 0, VOCAB, dtype=jnp.int32)
    logps2, h_final2 = dyad_decoder_decode_jit(tokens2, hidden0, params)
    jax.block_until_ready((logps2, h_final2))

    ref_logps2, ref_h2 = reference_decode(tokens2, hidden0, params)
    assert logps2.shape == (T2, OUT) and h_final2.shape == (1, 1, DIM)
    assert jnp.allclose(logps2, ref_logps2, atol=1e-4, rtol=1e-4)
    assert jnp.allclose(h_final2, ref_h2, atol=1e-4, rtol=1e-4)

    # --- Test 3: single-step API matching the module's forward(input, hidden) --
    logp1, h1 = dyad_decoder_forward(tokens[0], hidden0, params)
    jax.block_until_ready((logp1, h1))
    assert logp1.shape == (1, OUT) and h1.shape == (1, 1, DIM)
    assert jnp.allclose(logp1, ref_logps[0:1], atol=1e-5, rtol=1e-5)

    print("KERNEL_OK")
</pallas_src>

<mosaic_0001>
module attributes {stable_mosaic.version = 11 : i64} {
  func.func @kernel(%arg0: i32, %arg1: memref<8x32xf32, #tpu.memory_space<vmem>>, %arg2: memref<1x32xf32, #tpu.memory_space<vmem>>, %arg3: memref<32x96xf32, #tpu.memory_space<vmem>>, %arg4: memref<1x96xf32, #tpu.memory_space<vmem>>, %arg5: memref<32x128xf32, #tpu.memory_space<vmem>>, %arg6: memref<1x128xf32, #tpu.memory_space<vmem>>, %arg7: memref<8x32xf32, #tpu.memory_space<vmem>>, %arg8: memref<1x32xf32, #tpu.memory_space<vmem>>, %arg9: memref<1x32xf32, #tpu.memory_space<vmem>>, %arg10: memref<1x128xf32, #tpu.memory_space<vmem>>) attributes {dimension_semantics = [#tpu.dimension_semantics<arbitrary>], iteration_bounds = array<i64: 1>, scalar_prefetch = 0 : i64, scratch_operands = 2 : i64, tpu.core_type = #tpu.core_type<tc>, window_params = [{transform_indices = @transform_0, window_bounds = array<i64: 8, 32>}, {pipeline_mode = #tpu.pipeline_mode<synchronous>, transform_indices = @transform_1, window_bounds = array<i64: 1, 32>}, {pipeline_mode = #tpu.pipeline_mode<synchronous>, transform_indices = @transform_2, window_bounds = array<i64: 32, 96>}, {pipeline_mode = #tpu.pipeline_mode<synchronous>, transform_indices = @transform_3, window_bounds = array<i64: 1, 96>}, {pipeline_mode = #tpu.pipeline_mode<synchronous>, transform_indices = @transform_4, window_bounds = array<i64: 32, 128>}, {pipeline_mode = #tpu.pipeline_mode<synchronous>, transform_indices = @transform_5, window_bounds = array<i64: 1, 128>}, {transform_indices = @transform_6, window_bounds = array<i64: 8, 32>}, {pipeline_mode = #tpu.pipeline_mode<synchronous>, transform_indices = @transform_7, window_bounds = array<i64: 1, 32>}]} {
    %c0 = arith.constant 0 : index
    %c0_0 = arith.constant 0 : index
    %0 = vector.load %arg5[%c0, %c0_0] : memref<32x128xf32, #tpu.memory_space<vmem>>, vector<32x128xf32>
    %c0_1 = arith.constant 0 : index
    %c0_2 = arith.constant 0 : index
    %1 = vector.load %arg6[%c0_1, %c0_2] : memref<1x128xf32, #tpu.memory_space<vmem>>, vector<1x128xf32>
    %c0_i32 = arith.constant 0 : i32
    %2 = arith.cmpi eq, %arg0, %c0_i32 : i32
    %3 = arith.extui %2 : i1 to i32
    %c0_i32_3 = arith.constant 0 : i32
    %4 = arith.cmpi ne, %3, %c0_i32_3 : i32
    scf.if %4 {
      %c0_77 = arith.constant 0 : index
      %c0_78 = arith.constant 0 : index
      %354 = vector.load %arg2[%c0_77, %c0_78] : memref<1x32xf32, #tpu.memory_space<vmem>>, vector<1x32xf32>
      %c0_79 = arith.constant 0 : index
      %c0_80 = arith.constant 0 : index
      %355 = vector.load %arg9[%c0_79, %c0_80] : memref<1x32xf32, #tpu.memory_space<vmem>>, vector<1x32xf32>
      tpu.vector_store %arg9[%c0_79, %c0_80], %354 {strides = array<i32>} : memref<1x32xf32, #tpu.memory_space<vmem>>, vector<1x32xf32>,
      %c0_81 = arith.constant 0 : index
      %c0_82 = arith.constant 0 : index
      %356 = vector.load %arg2[%c0_81, %c0_82] : memref<1x32xf32, #tpu.memory_space<vmem>>, vector<1x32xf32>
      %cst_83 = arith.constant dense<0.000000e+00> : vector<1x128xf32>
      %357 = tpu.matmul %356, %0, %cst_83 {dimension_numbers = #tpu.dot_dimension_numbers<[1], [0], [0], [1], [0, 0, 1, 1], [], []>} : vector<1x32xf32>, vector<32x128xf32>, vector<1x128xf32> -> vector<1x128xf32>
      %358 = arith.addf %357, %1 : vector<1x128xf32>
      %c0_84 = arith.constant 0 : index
      %c0_85 = arith.constant 0 : index
      %359 = vector.load %arg10[%c0_84, %c0_85] : memref<1x128xf32, #tpu.memory_space<vmem>>, vector<1x128xf32>
      tpu.vector_store %arg10[%c0_84, %c0_85], %358 {strides = array<i32>} : memref<1x128xf32, #tpu.memory_space<vmem>>, vector<1x128xf32>,
    } else {
    }
    %c0_4 = arith.constant 0 : index
    %c0_5 = arith.constant 0 : index
    %5 = vector.load %arg1[%c0_4, %c0_5] : memref<8x32xf32, #tpu.memory_space<vmem>>, vector<8x32xf32>
    %c0_6 = arith.constant 0 : index
    %c0_7 = arith.constant 0 : index
    %6 = vector.load %arg3[%c0_6, %c0_7] : memref<32x96xf32, #tpu.memory_space<vmem>>, vector<32x96xf32>
    %cst = arith.constant dense<0.000000e+00> : vector<8x96xf32>
    %7 = tpu.matmul %5, %6, %cst {dimension_numbers = #tpu.dot_dimension_numbers<[1], [0], [0], [1], [0, 0, 1, 1], [], []>} : vector<8x32xf32>, vector<32x96xf32>, vector<8x96xf32> -> vector<8x96xf32>
    %c0_8 = arith.constant 0 : index
    %c0_9 = arith.constant 0 : index
    %8 = vector.load %arg4[%c0_8, %c0_9] : memref<1x96xf32, #tpu.memory_space<vmem>>, vector<1x96xf32>
    %9 = vector.broadcast %8 : vector<1x96xf32> to vector<8x96xf32>
    %10 = arith.addf %7, %9 : vector<8x96xf32>
    %c0_10 = arith.constant 0 : index
    %c0_11 = arith.constant 0 : index
    %11 = vector.load %arg9[%c0_10, %c0_11] : memref<1x32xf32, #tpu.memory_space<vmem>>, vector<1x32xf32>
    %c0_12 = arith.constant 0 : index
    %c0_13 = arith.constant 0 : index
    %12 = vector.load %arg10[%c0_12, %c0_13] : memref<1x128xf32, #tpu.memory_space<vmem>>, vector<1x128xf32>
    %13 = vector.extract_strided_slice %10 {offsets = [0, 0], sizes = [1, 96], strides = [1, 1]} : vector<8x96xf32> to vector<1x96xf32>
    %14 = vector.extract_strided_slice %13 {offsets = [0, 0], sizes = [1, 32], strides = [1, 1]} : vector<1x96xf32> to vector<1x32xf32>
    %15 = vector.extract_strided_slice %12 {offsets = [0, 0], sizes = [1, 32], strides = [1, 1]} : vector<1x128xf32> to vector<1x32xf32>
    %16 = arith.addf %14, %15 : vector<1x32xf32>
    %17 = arith.negf %16 : vector<1x32xf32>
    %18 = math.exp %17 : vector<1x32xf32>
    %cst_14 = arith.constant 1.000000e+00 : f32
    %19 = vector.broadcast %cst_14 : f32 to vector<1x32xf32>
    %20 = arith.addf %19, %18 : vector<1x32xf32>
    %21 = arith.divf %19, %20 : vector<1x32xf32>
    %22 = vector.extract_strided_slice %13 {offsets = [0, 32], sizes = [1, 32], strides = [1, 1]} : vector<1x96xf32> to vector<1x32xf32>
    %23 = vector.extract_strided_slice %12 {offsets = [0, 32], sizes = [1, 32], strides = [1, 1]} : vector<1x128xf32> to vector<1x32xf32>
    %24 = arith.addf %22, %23 : vector<1x32xf32>
    %25 = arith.negf %24 : vector<1x32xf32>
    %26 = math.exp %25 : vector<1x32xf32>
    %cst_15 = arith.constant 1.000000e+00 : f32
    %27 = vector.broadcast %cst_15 : f32 to vector<1x32xf32>
    %28 = arith.addf %27, %26 : vector<1x32xf32>
    %29 = arith.divf %27, %28 : vector<1x32xf32>
    %30 = vector.extract_strided_slice %13 {offsets = [0, 64], sizes = [1, 32], strides = [1, 1]} : vector<1x96xf32> to vector<1x32xf32>
    %31 = vector.extract_strided_slice %12 {offsets = [0, 64], sizes = [1, 32], strides = [1, 1]} : vector<1x128xf32> to vector<1x32xf32>
    %32 = arith.mulf %21, %31 : vector<1x32xf32>
    %33 = arith.addf %30, %32 : vector<1x32xf32>
    %34 = math.tanh %33 : vector<1x32xf32>
    %cst_16 = arith.constant 1.000000e+00 : f32
    %35 = vector.broadcast %cst_16 : f32 to vector<1x32xf32>
    %36 = arith.subf %35, %29 : vector<1x32xf32>
    %37 = arith.mulf %36, %34 : vector<1x32xf32>
    %38 = arith.mulf %29, %11 : vector<1x32xf32>
    %39 = arith.addf %37, %38 : vector<1x32xf32>
    %cst_17 = arith.constant dense<0.000000e+00> : vector<1x128xf32>
    %40 = tpu.matmul %39, %0, %cst_17 {dimension_numbers = #tpu.dot_dimension_numbers<[1], [0], [0], [1], [0, 0, 1, 1], [], []>} : vector<1x32xf32>, vector<32x128xf32>, vector<1x128xf32> -> vector<1x128xf32>
    %41 = arith.addf %40, %1 : vector<1x128xf32>
    %42 = vector.extract_strided_slice %41 {offsets = [0, 96], sizes = [1, 32], strides = [1, 1]} : vector<1x128xf32> to vector<1x32xf32>
    %cst_18 = arith.constant dense<0xFF800000> : vector<1xf32>
    %43 = vector.multi_reduction <maximumf>, %42, %cst_18 [1] : vector<1x32xf32> to vector<1xf32>
    %44 = vector.shape_cast %43 : vector<1xf32> to vector<1x1xf32>
    %45 = vector.broadcast %44 : vector<1x1xf32> to vector<1x32xf32>
    %46 = arith.subf %42, %45 : vector<1x32xf32>
    %47 = math.exp %46 : vector<1x32xf32>
    %cst_19 = arith.constant dense<0.000000e+00> : vector<1xf32>
    %48 = vector.multi_reduction <add>, %47, %cst_19 [1] : vector<1x32xf32> to vector<1xf32>
    %49 = vector.shape_cast %48 : vector<1xf32> to vector<1x1xf32>
    %50 = math.log %49 : vector<1x1xf32>
    %51 = arith.addf %50, %44 : vector<1x1xf32>
    %52 = vector.broadcast %51 : vector<1x1xf32> to vector<1x32xf32>
    %53 = arith.subf %42, %52 : vector<1x32xf32>
    %c0_20 = arith.constant 0 : index
    %c0_21 = arith.constant 0 : index
    %54 = vector.load %arg7[%c0_20, %c0_21] : memref<8x32xf32, #tpu.memory_space<vmem>>, vector<1x32xf32>
    tpu.vector_store %arg7[%c0_20, %c0_21], %53 {strides = array<i32>} : memref<8x32xf32, #tpu.memory_space<vmem>>, vector<1x32xf32>,
    %55 = vector.extract_strided_slice %10 {offsets = [1, 0], sizes = [1, 96], strides = [1, 1]} : vector<8x96xf32> to vector<1x96xf32>
    %56 = vector.extract_strided_slice %55 {offsets = [0, 0], sizes = [1, 32], strides = [1, 1]} : vector<1x96xf32> to vector<1x32xf32>
    %57 = vector.extract_strided_slice %41 {offsets = [0, 0], sizes = [1, 32], strides = [1, 1]} : vector<1x128xf32> to vector<1x32xf32>
    %58 = arith.addf %56, %57 : vector<1x32xf32>
    %59 = arith.negf %58 : vector<1x32xf32>
    %60 = math.exp %59 : vector<1x32xf32>
    %cst_22 = arith.constant 1.000000e+00 : f32
    %61 = vector.broadcast %cst_22 : f32 to vector<1x32xf32>
    %62 = arith.addf %61, %60 : vector<1x32xf32>
    %63 = arith.divf %61, %62 : vector<1x32xf32>
    %64 = vector.extract_strided_slice %55 {offsets = [0, 32], sizes = [1, 32], strides = [1, 1]} : vector<1x96xf32> to vector<1x32xf32>
    %65 = vector.extract_strided_slice %41 {offsets = [0, 32], sizes = [1, 32], strides = [1, 1]} : vector<1x128xf32> to vector<1x32xf32>
    %66 = arith.addf %64, %65 : vector<1x32xf32>
    %67 = arith.negf %66 : vector<1x32xf32>
    %68 = math.exp %67 : vector<1x32xf32>
    %cst_23 = arith.constant 1.000000e+00 : f32
    %69 = vector.broadcast %cst_23 : f32 to vector<1x32xf32>
    %70 = arith.addf %69, %68 : vector<1x32xf32>
    %71 = arith.divf %69, %70 : vector<1x32xf32>
    %72 = vector.extract_strided_slice %55 {offsets = [0, 64], sizes = [1, 32], strides = [1, 1]} : vector<1x96xf32> to vector<1x32xf32>
    %73 = vector.extract_strided_slice %41 {offsets = [0, 64], sizes = [1, 32], strides = [1, 1]} : vector<1x128xf32> to vector<1x32xf32>
    %74 = arith.mulf %63, %73 : vector<1x32xf32>
    %75 = arith.addf %72, %74 : vector<1x32xf32>
    %76 = math.tanh %75 : vector<1x32xf32>
    %cst_24 = arith.constant 1.000000e+00 : f32
    %77 = vector.broadcast %cst_24 : f32 to vector<1x32xf32>
    %78 = arith.subf %77, %71 : vector<1x32xf32>
    %79 = arith.mulf %78, %76 : vector<1x32xf32>
    %80 = arith.mulf %71, %39 : vector<1x32xf32>
    %81 = arith.addf %79, %80 : vector<1x32xf32>
    %cst_25 = arith.constant dense<0.000000e+00> : vector<1x128xf32>
    %82 = tpu.matmul %81, %0, %cst_25 {dimension_numbers = #tpu.dot_dimension_numbers<[1], [0], [0], [1], [0, 0, 1, 1], [], []>} : vector<1x32xf32>, vector<32x128xf32>, vector<1x128xf32> -> vector<1x128xf32>
    %83 = arith.addf %82, %1 : vector<1x128xf32>
    %84 = vector.extract_strided_slice %83 {offsets = [0, 96], sizes = [1, 32], strides = [1, 1]} : vector<1x128xf32> to vector<1x32xf32>
    %cst_26 = arith.constant dense<0xFF800000> : vector<1xf32>
    %85 = vector.multi_reduction <maximumf>, %84, %cst_26 [1] : vector<1x32xf32> to vector<1xf32>
    %86 = vector.shape_cast %85 : vector<1xf32> to vector<1x1xf32>
    %87 = vector.broadcast %86 : vector<1x1xf32> to vector<1x32xf32>
    %88 = arith.subf %84, %87 : vector<1x32xf32>
    %89 = math.exp %88 : vector<1x32xf32>
    %cst_27 = arith.constant dense<0.000000e+00> : vector<1xf32>
    %90 = vector.multi_reduction <add>, %89, %cst_27 [1] : vector<1x32xf32> to vector<1xf32>
    %91 = vector.shape_cast %90 : vector<1xf32> to vector<1x1xf32>
    %92 = math.log %91 : vector<1x1xf32>
    %93 = arith.addf %92, %86 : vector<1x1xf32>
    %94 = vector.broadcast %93 : vector<1x1xf32> to vector<1x32xf32>
    %95 = arith.subf %84, %94 : vector<1x32xf32>
    %c1 = arith.constant 1 : index
    %c0_28 = arith.constant 0 : index
    %96 = vector.load %arg7[%c1, %c0_28] : memref<8x32xf32, #tpu.memory_space<vmem>>, vector<1x32xf32>
    tpu.vector_store %arg7[%c1, %c0_28], %95 {strides = array<i32>} : memref<8x32xf32, #tpu.memory_space<vmem>>, vector<1x32xf32>,
    %97 = vector.extract_strided_slice %10 {offsets = [2, 0], sizes = [1, 96], strides = [1, 1]} : vector<8x96xf32> to vector<1x96xf32>
    %98 = vector.extract_strided_slice %97 {offsets = [0, 0], sizes = [1, 32], strides = [1, 1]} : vector<1x96xf32> to vector<1x32xf32>
    %99 = vector.extract_strided_slice %83 {offsets = [0, 0], sizes = [1, 32], strides = [1, 1]} : vector<1x128xf32> to vector<1x32xf32>
    %100 = arith.addf %98, %99 : vector<1x32xf32>
    %101 = arith.negf %100 : vector<1x32xf32>
    %102 = math.exp %101 : vector<1x32xf32>
    %cst_29 = arith.constant 1.000000e+00 : f32
    %103 = vector.broadcast %cst_29 : f32 to vector<1x32xf32>
    %104 = arith.addf %103, %102 : vector<1x32xf32>
    %105 = arith.divf %103, %104 : vector<1x32xf32>
    %106 = vector.extract_strided_slice %97 {offsets = [0, 32], sizes = [1, 32], strides = [1, 1]} : vector<1x96xf32> to vector<1x32xf32>
    %107 = vector.extract_strided_slice %83 {offsets = [0, 32], sizes = [1, 32], strides = [1, 1]} : vector<1x128xf32> to vector<1x32xf32>
    %108 = arith.addf %106, %107 : vector<1x32xf32>
    %109 = arith.negf %108 : vector<1x32xf32>
    %110 = math.exp %109 : vector<1x32xf32>
    %cst_30 = arith.constant 1.000000e+00 : f32
    %111 = vector.broadcast %cst_30 : f32 to vector<1x32xf32>
    %112 = arith.addf %111, %110 : vector<1x32xf32>
    %113 = arith.divf %111, %112 : vector<1x32xf32>
    %114 = vector.extract_strided_slice %97 {offsets = [0, 64], sizes = [1, 32], strides = [1, 1]} : vector<1x96xf32> to vector<1x32xf32>
    %115 = vector.extract_strided_slice %83 {offsets = [0, 64], sizes = [1, 32], strides = [1, 1]} : vector<1x128xf32> to vector<1x32xf32>
    %116 = arith.mulf %105, %115 : vector<1x32xf32>
    %117 = arith.addf %114, %116 : vector<1x32xf32>
    %118 = math.tanh %117 : vector<1x32xf32>
    %cst_31 = arith.constant 1.000000e+00 : f32
    %119 = vector.broadcast %cst_31 : f32 to vector<1x32xf32>
    %120 = arith.subf %119, %113 : vector<1x32xf32>
    %121 = arith.mulf %120, %118 : vector<1x32xf32>
    %122 = arith.mulf %113, %81 : vector<1x32xf32>
    %123 = arith.addf %121, %122 : vector<1x32xf32>
    %cst_32 = arith.constant dense<0.000000e+00> : vector<1x128xf32>
    %124 = tpu.matmul %123, %0, %cst_32 {dimension_numbers = #tpu.dot_dimension_numbers<[1], [0], [0], [1], [0, 0, 1, 1], [], []>} : vector<1x32xf32>, vector<32x128xf32>, vector<1x128xf32> -> vector<1x128xf32>
    %125 = arith.addf %124, %1 : vector<1x128xf32>
    %126 = vector.extract_strided_slice %125 {offsets = [0, 96], sizes = [1, 32], strides = [1, 1]} : vector<1x128xf32> to vector<1x32xf32>
    %cst_33 = arith.constant dense<0xFF800000> : vector<1xf32>
    %127 = vector.multi_reduction <maximumf>, %126, %cst_33 [1] : vector<1x32xf32> to vector<1xf32>
    %128 = vector.shape_cast %127 : vector<1xf32> to vector<1x1xf32>
    %129 = vector.broadcast %128 : vector<1x1xf32> to vector<1x32xf32>
    %130 = arith.subf %126, %129 : vector<1x32xf32>
    %131 = math.exp %130 : vector<1x32xf32>
    %cst_34 = arith.constant dense<0.000000e+00> : vector<1xf32>
    %132 = vector.multi_reduction <add>, %131, %cst_34 [1] : vector<1x32xf32> to vector<1xf32>
    %133 = vector.shape_cast %132 : vector<1xf32> to vector<1x1xf32>
    %134 = math.log %133 : vector<1x1xf32>
    %135 = arith.addf %134, %128 : vector<1x1xf32>
    %136 = vector.broadcast %135 : vector<1x1xf32> to vector<1x32xf32>
    %137 = arith.subf %126, %136 : vector<1x32xf32>
    %c2 = arith.constant 2 : index
    %c0_35 = arith.constant 0 : index
    %138 = vector.load %arg7[%c2, %c0_35] : memref<8x32xf32, #tpu.memory_space<vmem>>, vector<1x32xf32>
    tpu.vector_store %arg7[%c2, %c0_35], %137 {strides = array<i32>} : memref<8x32xf32, #tpu.memory_space<vmem>>, vector<1x32xf32>,
    %139 = vector.extract_strided_slice %10 {offsets = [3, 0], sizes = [1, 96], strides = [1, 1]} : vector<8x96xf32> to vector<1x96xf32>
    %140 = vector.extract_strided_slice %139 {offsets = [0, 0], sizes = [1, 32], strides = [1, 1]} : vector<1x96xf32> to vector<1x32xf32>
    %141 = vector.extract_strided_slice %125 {offsets = [0, 0], sizes = [1, 32], strides = [1, 1]} : vector<1x128xf32> to vector<1x32xf32>
    %142 = arith.addf %140, %141 : vector<1x32xf32>
    %143 = arith.negf %142 : vector<1x32xf32>
    %144 = math.exp %143 : vector<1x32xf32>
    %cst_36 = arith.constant 1.000000e+00 : f32
    %145 = vector.broadcast %cst_36 : f32 to vector<1x32xf32>
    %146 = arith.addf %145, %144 : vector<1x32xf32>
    %147 = arith.divf %145, %146 : vector<1x32xf32>
    %148 = vector.extract_strided_slice %139 {offsets = [0, 32], sizes = [1, 32], strides = [1, 1]} : vector<1x96xf32> to vector<1x32xf32>
    %149 = vector.extract_strided_slice %125 {offsets = [0, 32], sizes = [1, 32], strides = [1, 1]} : vector<1x128xf32> to vector<1x32xf32>
    %150 = arith.addf %148, %149 : vector<1x32xf32>
    %151 = arith.negf %150 : vector<1x32xf32>
    %152 = math.exp %151 : vector<1x32xf32>
    %cst_37 = arith.constant 1.000000e+00 : f32
    %153 = vector.broadcast %cst_37 : f32 to vector<1x32xf32>
    %154 = arith.addf %153, %152 : vector<1x32xf32>
    %155 = arith.divf %153, %154 : vector<1x32xf32>
    %156 = vector.extract_strided_slice %139 {offsets = [0, 64], sizes = [1, 32], strides = [1, 1]} : vector<1x96xf32> to vector<1x32xf32>
    %157 = vector.extract_strided_slice %125 {offsets = [0, 64], sizes = [1, 32], strides = [1, 1]} : vector<1x128xf32> to vector<1x32xf32>
    %158 = arith.mulf %147, %157 : vector<1x32xf32>
    %159 = arith.addf %156, %158 : vector<1x32xf32>
    %160 = math.tanh %159 : vector<1x32xf32>
    %cst_38 = arith.constant 1.000000e+00 : f32
    %161 = vector.broadcast %cst_38 : f32 to vector<1x32xf32>
    %162 = arith.subf %161, %155 : vector<1x32xf32>
    %163 = arith.mulf %162, %160 : vector<1x32xf32>
    %164 = arith.mulf %155, %123 : vector<1x32xf32>
    %165 = arith.addf %163, %164 : vector<1x32xf32>
    %cst_39 = arith.constant dense<0.000000e+00> : vector<1x128xf32>
    %166 = tpu.matmul %165, %0, %cst_39 {dimension_numbers = #tpu.dot_dimension_numbers<[1], [0], [0], [1], [0, 0, 1, 1], [], []>} : vector<1x32xf32>, vector<32x128xf32>, vector<1x128xf32> -> vector<1x128xf32>
    %167 = arith.addf %166, %1 : vector<1x128xf32>
    %168 = vector.extract_strided_slice %167 {offsets = [0, 96], sizes = [1, 32], strides = [1, 1]} : vector<1x128xf32> to vector<1x32xf32>
    %cst_40 = arith.constant dense<0xFF800000> : vector<1xf32>
    %169 = vector.multi_reduction <maximumf>, %168, %cst_40 [1] : vector<1x32xf32> to vector<1xf32>
    %170 = vector.shape_cast %169 : vector<1xf32> to vector<1x1xf32>
    %171 = vector.broadcast %170 : vector<1x1xf32> to vector<1x32xf32>
    %172 = arith.subf %168, %171 : vector<1x32xf32>
    %173 = math.exp %172 : vector<1x32xf32>
    %cst_41 = arith.constant dense<0.000000e+00> : vector<1xf32>
    %174 = vector.multi_reduction <add>, %173, %cst_41 [1] : vector<1x32xf32> to vector<1xf32>
    %175 = vector.shape_cast %174 : vector<1xf32> to vector<1x1xf32>
    %176 = math.log %175 : vector<1x1xf32>
    %177 = arith.addf %176, %170 : vector<1x1xf32>
    %178 = vector.broadcast %177 : vector<1x1xf32> to vector<1x32xf32>
    %179 = arith.subf %168, %178 : vector<1x32xf32>
    %c3 = arith.constant 3 : index
    %c0_42 = arith.constant 0 : index
    %180 = vector.load %arg7[%c3, %c0_42] : memref<8x32xf32, #tpu.memory_space<vmem>>, vector<1x32xf32>
    tpu.vector_store %arg7[%c3, %c0_42], %179 {strides = array<i32>} : memref<8x32xf32, #tpu.memory_space<vmem>>, vector<1x32xf32>,
    %181 = vector.extract_strided_slice %10 {offsets = [4, 0], sizes = [1, 96], strides = [1, 1]} : vector<8x96xf32> to vector<1x96xf32>
    %182 = vector.extract_strided_slice %181 {offsets = [0, 0], sizes = [1, 32], strides = [1, 1]} : vector<1x96xf32> to vector<1x32xf32>
    %183 = vector.extract_strided_slice %167 {offsets = [0, 0], sizes = [1, 32], strides = [1, 1]} : vector<1x128xf32> to vector<1x32xf32>
    %184 = arith.addf %182, %183 : vector<1x32xf32>
    %185 = arith.negf %184 : vector<1x32xf32>
    %186 = math.exp %185 : vector<1x32xf32>
    %cst_43 = arith.constant 1.000000e+00 : f32
    %187 = vector.broadcast %cst_43 : f32 to vector<1x32xf32>
    %188 = arith.addf %187, %186 : vector<1x32xf32>
    %189 = arith.divf %187, %188 : vector<1x32xf32>
    %190 = vector.extract_strided_slice %181 {offsets = [0, 32], sizes = [1, 32], strides = [1, 1]} : vector<1x96xf32> to vector<1x32xf32>
    %191 = vector.extract_strided_slice %167 {offsets = [0, 32], sizes = [1, 32], strides = [1, 1]} : vector<1x128xf32> to vector<1x32xf32>
    %192 = arith.addf %190, %191 : vector<1x32xf32>
    %193 = arith.negf %192 : vector<1x32xf32>
    %194 = math.exp %193 : vector<1x32xf32>
    %cst_44 = arith.constant 1.000000e+00 : f32
    %195 = vector.broadcast %cst_44 : f32 to vector<1x32xf32>
    %196 = arith.addf %195, %194 : vector<1x32xf32>
    %197 = arith.divf %195, %196 : vector<1x32xf32>
    %198 = vector.extract_strided_slice %181 {offsets = [0, 64], sizes = [1, 32], strides = [1, 1]} : vector<1x96xf32> to vector<1x32xf32>
    %199 = vector.extract_strided_slice %167 {offsets = [0, 64], sizes = [1, 32], strides = [1, 1]} : vector<1x128xf32> to vector<1x32xf32>
    %200 = arith.mulf %189, %199 : vector<1x32xf32>
    %201 = arith.addf %198, %200 : vector<1x32xf32>
    %202 = math.tanh %201 : vector<1x32xf32>
    %cst_45 = arith.constant 1.000000e+00 : f32
    %203 = vector.broadcast %cst_45 : f32 to vector<1x32xf32>
    %204 = arith.subf %203, %197 : vector<1x32xf32>
    %205 = arith.mulf %204, %202 : vector<1x32xf32>
    %206 = arith.mulf %197, %165 : vector<1x32xf32>
    %207 = arith.addf %205, %206 : vector<1x32xf32>
    %cst_46 = arith.constant dense<0.000000e+00> : vector<1x128xf32>
    %208 = tpu.matmul %207, %0, %cst_46 {dimension_numbers = #tpu.dot_dimension_numbers<[1], [0], [0], [1], [0, 0, 1, 1], [], []>} : vector<1x32xf32>, vector<32x128xf32>, vector<1x128xf32> -> vector<1x128xf32>
    %209 = arith.addf %208, %1 : vector<1x128xf32>
    %210 = vector.extract_strided_slice %209 {offsets = [0, 96], sizes = [1, 32], strides = [1, 1]} : vector<1x128xf32> to vector<1x32xf32>
    %cst_47 = arith.constant dense<0xFF800000> : vector<1xf32>
    %211 = vector.multi_reduction <maximumf>, %210, %cst_47 [1] : vector<1x32xf32> to vector<1xf32>
    %212 = vector.shape_cast %211 : vector<1xf32> to vector<1x1xf32>
    %213 = vector.broadcast %212 : vector<1x1xf32> to vector<1x32xf32>
    %214 = arith.subf %210, %213 : vector<1x32xf32>
    %215 = math.exp %214 : vector<1x32xf32>
    %cst_48 = arith.constant dense<0.000000e+00> : vector<1xf32>
    %216 = vector.multi_reduction <add>, %215, %cst_48 [1] : vector<1x32xf32> to vector<1xf32>
    %217 = vector.shape_cast %216 : vector<1xf32> to vector<1x1xf32>
    %218 = math.log %217 : vector<1x1xf32>
    %219 = arith.addf %218, %212 : vector<1x1xf32>
    %220 = vector.broadcast %219 : vector<1x1xf32> to vector<1x32xf32>
    %221 = arith.subf %210, %220 : vector<1x32xf32>
    %c4 = arith.constant 4 : index
    %c0_49 = arith.constant 0 : index
    %222 = vector.load %arg7[%c4, %c0_49] : memref<8x32xf32, #tpu.memory_space<vmem>>, vector<1x32xf32>
    tpu.vector_store %arg7[%c4, %c0_49], %221 {strides = array<i32>} : memref<8x32xf32, #tpu.memory_space<vmem>>, vector<1x32xf32>,
    %223 = vector.extract_strided_slice %10 {offsets = [5, 0], sizes = [1, 96], strides = [1, 1]} : vector<8x96xf32> to vector<1x96xf32>
    %224 = vector.extract_strided_slice %223 {offsets = [0, 0], sizes = [1, 32], strides = [1, 1]} : vector<1x96xf32> to vector<1x32xf32>
    %225 = vector.extract_strided_slice %209 {offsets = [0, 0], sizes = [1, 32], strides = [1, 1]} : vector<1x128xf32> to vector<1x32xf32>
    %226 = arith.addf %224, %225 : vector<1x32xf32>
    %227 = arith.negf %226 : vector<1x32xf32>
    %228 = math.exp %227 : vector<1x32xf32>
    %cst_50 = arith.constant 1.000000e+00 : f32
    %229 = vector.broadcast %cst_50 : f32 to vector<1x32xf32>
    %230 = arith.addf %229, %228 : vector<1x32xf32>
    %231 = arith.divf %229, %230 : vector<1x32xf32>
    %232 = vector.extract_strided_slice %223 {offsets = [0, 32], sizes = [1, 32], strides = [1, 1]} : vector<1x96xf32> to vector<1x32xf32>
    %233 = vector.extract_strided_slice %209 {offsets = [0, 32], sizes = [1, 32], strides = [1, 1]} : vector<1x128xf32> to vector<1x32xf32>
    %234 = arith.addf %232, %233 : vector<1x32xf32>
    %235 = arith.negf %234 : vector<1x32xf32>
    %236 = math.exp %235 : vector<1x32xf32>
    %cst_51 = arith.constant 1.000000e+00 : f32
    %237 = vector.broadcast %cst_51 : f32 to vector<1x32xf32>
    %238 = arith.addf %237, %236 : vector<1x32xf32>
    %239 = arith.divf %237, %238 : vector<1x32xf32>
    %240 = vector.extract_strided_slice %223 {offsets = [0, 64], sizes = [1, 32], strides = [1, 1]} : vector<1x96xf32> to vector<1x32xf32>
    %241 = vector.extract_strided_slice %209 {offsets = [0, 64], sizes = [1, 32], strides = [1, 1]} : vector<1x128xf32> to vector<1x32xf32>
    %242 = arith.mulf %231, %241 : vector<1x32xf32>
    %243 = arith.addf %240, %242 : vector<1x32xf32>
    %244 = math.tanh %243 : vector<1x32xf32>
    %cst_52 = arith.constant 1.000000e+00 : f32
    %245 = vector.broadcast %cst_52 : f32 to vector<1x32xf32>
    %246 = arith.subf %245, %239 : vector<1x32xf32>
    %247 = arith.mulf %246, %244 : vector<1x32xf32>
    %248 = arith.mulf %239, %207 : vector<1x32xf32>
    %249 = arith.addf %247, %248 : vector<1x32xf32>
    %cst_53 = arith.constant dense<0.000000e+00> : vector<1x128xf32>
    %250 = tpu.matmul %249, %0, %cst_53 {dimension_numbers = #tpu.dot_dimension_numbers<[1], [0], [0], [1], [0, 0, 1, 1], [], []>} : vector<1x32xf32>, vector<32x128xf32>, vector<1x128xf32> -> vector<1x128xf32>
    %251 = arith.addf %250, %1 : vector<1x128xf32>
    %252 = vector.extract_strided_slice %251 {offsets = [0, 96], sizes = [1, 32], strides = [1, 1]} : vector<1x128xf32> to vector<1x32xf32>
    %cst_54 = arith.constant dense<0xFF800000> : vector<1xf32>
    %253 = vector.multi_reduction <maximumf>, %252, %cst_54 [1] : vector<1x32xf32> to vector<1xf32>
    %254 = vector.shape_cast %253 : vector<1xf32> to vector<1x1xf32>
    %255 = vector.broadcast %254 : vector<1x1xf32> to vector<1x32xf32>
    %256 = arith.subf %252, %255 : vector<1x32xf32>
    %257 = math.exp %256 : vector<1x32xf32>
    %cst_55 = arith.constant dense<0.000000e+00> : vector<1xf32>
    %258 = vector.multi_reduction <add>, %257, %cst_55 [1] : vector<1x32xf32> to vector<1xf32>
    %259 = vector.shape_cast %258 : vector<1xf32> to vector<1x1xf32>
    %260 = math.log %259 : vector<1x1xf32>
    %261 = arith.addf %260, %254 : vector<1x1xf32>
    %262 = vector.broadcast %261 : vector<1x1xf32> to vector<1x32xf32>
    %263 = arith.subf %252, %262 : vector<1x32xf32>
    %c5 = arith.constant 5 : index
    %c0_56 = arith.constant 0 : index
    %264 = vector.load %arg7[%c5, %c0_56] : memref<8x32xf32, #tpu.memory_space<vmem>>, vector<1x32xf32>
    tpu.vector_store %arg7[%c5, %c0_56], %263 {strides = array<i32>} : memref<8x32xf32, #tpu.memory_space<vmem>>, vector<1x32xf32>,
    %265 = vector.extract_strided_slice %10 {offsets = [6, 0], sizes = [1, 96], strides = [1, 1]} : vector<8x96xf32> to vector<1x96xf32>
    %266 = vector.extract_strided_slice %265 {offsets = [0, 0], sizes = [1, 32], strides = [1, 1]} : vector<1x96xf32> to vector<1x32xf32>
    %267 = vector.extract_strided_slice %251 {offsets = [0, 0], sizes = [1, 32], strides = [1, 1]} : vector<1x128xf32> to vector<1x32xf32>
    %268 = arith.addf %266, %267 : vector<1x32xf32>
    %269 = arith.negf %268 : vector<1x32xf32>
    %270 = math.exp %269 : vector<1x32xf32>
    %cst_57 = arith.constant 1.000000e+00 : f32
    %271 = vector.broadcast %cst_57 : f32 to vector<1x32xf32>
    %272 = arith.addf %271, %270 : vector<1x32xf32>
    %273 = arith.divf %271, %272 : vector<1x32xf32>
    %274 = vector.extract_strided_slice %265 {offsets = [0, 32], sizes = [1, 32], strides = [1, 1]} : vector<1x96xf32> to vector<1x32xf32>
    %275 = vector.extract_strided_slice %251 {offsets = [0, 32], sizes = [1, 32], strides = [1, 1]} : vector<1x128xf32> to vector<1x32xf32>
    %276 = arith.addf %274, %275 : vector<1x32xf32>
    %277 = arith.negf %276 : vector<1x32xf32>
    %278 = math.exp %277 : vector<1x32xf32>
    %cst_58 = arith.constant 1.000000e+00 : f32
    %279 = vector.broadcast %cst_58 : f32 to vector<1x32xf32>
    %280 = arith.addf %279, %278 : vector<1x32xf32>
    %281 = arith.divf %279, %280 : vector<1x32xf32>
    %282 = vector.extract_strided_slice %265 {offsets = [0, 64], sizes = [1, 32], strides = [1, 1]} : vector<1x96xf32> to vector<1x32xf32>
    %283 = vector.extract_strided_slice %251 {offsets = [0, 64], sizes = [1, 32], strides = [1, 1]} : vector<1x128xf32> to vector<1x32xf32>
    %284 = arith.mulf %273, %283 : vector<1x32xf32>
    %285 = arith.addf %282, %284 : vector<1x32xf32>
    %286 = math.tanh %285 : vector<1x32xf32>
    %cst_59 = arith.constant 1.000000e+00 : f32
    %287 = vector.broadcast %cst_59 : f32 to vector<1x32xf32>
    %288 = arith.subf %287, %281 : vector<1x32xf32>
    %289 = arith.mulf %288, %286 : vector<1x32xf32>
    %290 = arith.mulf %281, %249 : vector<1x32xf32>
    %291 = arith.addf %289, %290 : vector<1x32xf32>
    %cst_60 = arith.constant dense<0.000000e+00> : vector<1x128xf32>
    %292 = tpu.matmul %291, %0, %cst_60 {dimension_numbers = #tpu.dot_dimension_numbers<[1], [0], [0], [1], [0, 0, 1, 1], [], []>} : vector<1x32xf32>, vector<32x128xf32>, vector<1x128xf32> -> vector<1x128xf32>
    %293 = arith.addf %292, %1 : vector<1x128xf32>
    %294 = vector.extract_strided_slice %293 {offsets = [0, 96], sizes = [1, 32], strides = [1, 1]} : vector<1x128xf32> to vector<1x32xf32>
    %cst_61 = arith.constant dense<0xFF800000> : vector<1xf32>
    %295 = vector.multi_reduction <maximumf>, %294, %cst_61 [1] : vector<1x32xf32> to vector<1xf32>
    %296 = vector.shape_cast %295 : vector<1xf32> to vector<1x1xf32>
    %297 = vector.broadcast %296 : vector<1x1xf32> to vector<1x32xf32>
    %298 = arith.subf %294, %297 : vector<1x32xf32>
    %299 = math.exp %298 : vector<1x32xf32>
    %cst_62 = arith.constant dense<0.000000e+00> : vector<1xf32>
    %300 = vector.multi_reduction <add>, %299, %cst_62 [1] : vector<1x32xf32> to vector<1xf32>
    %301 = vector.shape_cast %300 : vector<1xf32> to vector<1x1xf32>
    %302 = math.log %301 : vector<1x1xf32>
    %303 = arith.addf %302, %296 : vector<1x1xf32>
    %304 = vector.broadcast %303 : vector<1x1xf32> to vector<1x32xf32>
    %305 = arith.subf %294, %304 : vector<1x32xf32>
    %c6 = arith.constant 6 : index
    %c0_63 = arith.constant 0 : index
    %306 = vector.load %arg7[%c6, %c0_63] : memref<8x32xf32, #tpu.memory_space<vmem>>, vector<1x32xf32>
    tpu.vector_store %arg7[%c6, %c0_63], %305 {strides = array<i32>} : memref<8x32xf32, #tpu.memory_space<vmem>>, vector<1x32xf32>,
    %307 = vector.extract_strided_slice %10 {offsets = [7, 0], sizes = [1, 96], strides = [1, 1]} : vector<8x96xf32> to vector<1x96xf32>
    %308 = vector.extract_strided_slice %307 {offsets = [0, 0], sizes = [1, 32], strides = [1, 1]} : vector<1x96xf32> to vector<1x32xf32>
    %309 = vector.extract_strided_slice %293 {offsets = [0, 0], sizes = [1, 32], strides = [1, 1]} : vector<1x128xf32> to vector<1x32xf32>
    %310 = arith.addf %308, %309 : vector<1x32xf32>
    %311 = arith.negf %310 : vector<1x32xf32>
    %312 = math.exp %311 : vector<1x32xf32>
    %cst_64 = arith.constant 1.000000e+00 : f32
    %313 = vector.broadcast %cst_64 : f32 to vector<1x32xf32>
    %314 = arith.addf %313, %312 : vector<1x32xf32>
    %315 = arith.divf %313, %314 : vector<1x32xf32>
    %316 = vector.extract_strided_slice %307 {offsets = [0, 32], sizes = [1, 32], strides = [1, 1]} : vector<1x96xf32> to vector<1x32xf32>
    %317 = vector.extract_strided_slice %293 {offsets = [0, 32], sizes = [1, 32], strides = [1, 1]} : vector<1x128xf32> to vector<1x32xf32>
    %318 = arith.addf %316, %317 : vector<1x32xf32>
    %319 = arith.negf %318 : vector<1x32xf32>
    %320 = math.exp %319 : vector<1x32xf32>
    %cst_65 = arith.constant 1.000000e+00 : f32
    %321 = vector.broadcast %cst_65 : f32 to vector<1x32xf32>
    %322 = arith.addf %321, %320 : vector<1x32xf32>
    %323 = arith.divf %321, %322 : vector<1x32xf32>
    %324 = vector.extract_strided_slice %307 {offsets = [0, 64], sizes = [1, 32], strides = [1, 1]} : vector<1x96xf32> to vector<1x32xf32>
    %325 = vector.extract_strided_slice %293 {offsets = [0, 64], sizes = [1, 32], strides = [1, 1]} : vector<1x128xf32> to vector<1x32xf32>
    %326 = arith.mulf %315, %325 : vector<1x32xf32>
    %327 = arith.addf %324, %326 : vector<1x32xf32>
    %328 = math.tanh %327 : vector<1x32xf32>
    %cst_66 = arith.constant 1.000000e+00 : f32
    %329 = vector.broadcast %cst_66 : f32 to vector<1x32xf32>
    %330 = arith.subf %329, %323 : vector<1x32xf32>
    %331 = arith.mulf %330, %328 : vector<1x32xf32>
    %332 = arith.mulf %323, %291 : vector<1x32xf32>
    %333 = arith.addf %331, %332 : vector<1x32xf32>
    %cst_67 = arith.constant dense<0.000000e+00> : vector<1x128xf32>
    %334 = tpu.matmul %333, %0, %cst_67 {dimension_numbers = #tpu.dot_dimension_numbers<[1], [0], [0], [1], [0, 0, 1, 1], [], []>} : vector<1x32xf32>, vector<32x128xf32>, vector<1x128xf32> -> vector<1x128xf32>
    %335 = arith.addf %334, %1 : vector<1x128xf32>
    %336 = vector.extract_strided_slice %335 {offsets = [0, 96], sizes = [1, 32], strides = [1, 1]} : vector<1x128xf32> to vector<1x32xf32>
    %cst_68 = arith.constant dense<0xFF800000> : vector<1xf32>
    %337 = vector.multi_reduction <maximumf>, %336, %cst_68 [1] : vector<1x32xf32> to vector<1xf32>
    %338 = vector.shape_cast %337 : vector<1xf32> to vector<1x1xf32>
    %339 = vector.broadcast %338 : vector<1x1xf32> to vector<1x32xf32>
    %340 = arith.subf %336, %339 : vector<1x32xf32>
    %341 = math.exp %340 : vector<1x32xf32>
    %cst_69 = arith.constant dense<0.000000e+00> : vector<1xf32>
    %342 = vector.multi_reduction <add>, %341, %cst_69 [1] : vector<1x32xf32> to vector<1xf32>
    %343 = vector.shape_cast %342 : vector<1xf32> to vector<1x1xf32>
    %344 = math.log %343 : vector<1x1xf32>
    %345 = arith.addf %344, %338 : vector<1x1xf32>
    %346 = vector.broadcast %345 : vector<1x1xf32> to vector<1x32xf32>
    %347 = arith.subf %336, %346 : vector<1x32xf32>
    %c7 = arith.constant 7 : index
    %c0_70 = arith.constant 0 : index
    %348 = vector.load %arg7[%c7, %c0_70] : memref<8x32xf32, #tpu.memory_space<vmem>>, vector<1x32xf32>
    tpu.vector_store %arg7[%c7, %c0_70], %347 {strides = array<i32>} : memref<8x32xf32, #tpu.memory_space<vmem>>, vector<1x32xf32>,
    %c0_71 = arith.constant 0 : index
    %c0_72 = arith.constant 0 : index
    %349 = vector.load %arg9[%c0_71, %c0_72] : memref<1x32xf32, #tpu.memory_space<vmem>>, vector<1x32xf32>
    tpu.vector_store %arg9[%c0_71, %c0_72], %333 {strides = array<i32>} : memref<1x32xf32, #tpu.memory_space<vmem>>, vector<1x32xf32>,
    %c0_73 = arith.constant 0 : index
    %c0_74 = arith.constant 0 : index
    %350 = vector.load %arg10[%c0_73, %c0_74] : memref<1x128xf32, #tpu.memory_space<vmem>>, vector<1x128xf32>
    tpu.vector_store %arg10[%c0_73, %c0_74], %335 {strides = array<i32>} : memref<1x128xf32, #tpu.memory_space<vmem>>, vector<1x128xf32>,
    %c0_i32_75 = arith.constant 0 : i32
    %351 = arith.cmpi eq, %arg0, %c0_i32_75 : i32
    %352 = arith.extui %351 : i1 to i32
    %c0_i32_76 = arith.constant 0 : i32
    %353 = arith.cmpi ne, %352, %c0_i32_76 : i32
    scf.if %353 {
      %c0_77 = arith.constant 0 : index
      %c0_78 = arith.constant 0 : index
      %354 = vector.load %arg8[%c0_77, %c0_78] : memref<1x32xf32, #tpu.memory_space<vmem>>, vector<1x32xf32>
      tpu.vector_store %arg8[%c0_77, %c0_78], %333 {strides = array<i32>} : memref<1x32xf32, #tpu.memory_space<vmem>>, vector<1x32xf32>,
    } else {
    }
    return
  }
  func.func @transform_0(%arg0: i32) -> (i32, i32) {
    %c0_i32 = arith.constant 0 : i32
    %c0_i32_0 = arith.constant 0 : i32
    return %arg0, %c0_i32 : i32, i32
  }
  func.func @transform_1(%arg0: i32) -> (i32, i32) {
    %c0_i32 = arith.constant 0 : i32
    %c0_i32_0 = arith.constant 0 : i32
    %c0_i32_1 = arith.constant 0 : i32
    return %c0_i32, %c0_i32_0 : i32, i32
  }
  func.func @transform_2(%arg0: i32) -> (i32, i32) {
    %c0_i32 = arith.constant 0 : i32
    %c0_i32_0 = arith.constant 0 : i32
    %c0_i32_1 = arith.constant 0 : i32
    return %c0_i32, %c0_i32_0 : i32, i32
  }
  func.func @transform_3(%arg0: i32) -> (i32, i32) {
    %c0_i32 = arith.constant 0 : i32
    %c0_i32_0 = arith.constant 0 : i32
    %c0_i32_1 = arith.constant 0 : i32
    return %c0_i32, %c0_i32_0 : i32, i32
  }
  func.func @transform_4(%arg0: i32) -> (i32, i32) {
    %c0_i32 = arith.constant 0 : i32
    %c0_i32_0 = arith.constant 0 : i32
    %c0_i32_1 = arith.constant 0 : i32
    return %c0_i32, %c0_i32_0 : i32, i32
  }
  func.func @transform_5(%arg0: i32) -> (i32, i32) {
    %c0_i32 = arith.constant 0 : i32
    %c0_i32_0 = arith.constant 0 : i32
    %c0_i32_1 = arith.constant 0 : i32
    return %c0_i32, %c0_i32_0 : i32, i32
  }
  func.func @transform_6(%arg0: i32) -> (i32, i32) {
    %c0_i32 = arith.constant 0 : i32
    %c0_i32_0 = arith.constant 0 : i32
    return %arg0, %c0_i32 : i32, i32
  }
  func.func @transform_7(%arg0: i32) -> (i32, i32) {
    %c0_i32 = arith.constant 0 : i32
    %c0_i32_0 = arith.constant 0 : i32
    %c0_i32_1 = arith.constant 0 : i32
    return %c0_i32, %c0_i32_0 : i32, i32
  }
}

</mosaic_0001>

<bundles_post_ra>
// kernel: dyad_decoder_decode.1
= control target key start
LH: loop header
LB: loop body
LE: loop exit
PB: predicated region body
PF: predicated region fallthrough
CT: control target
= control target key end

     0   :  { %13 = vsyncpa [#allocation5], 0  ;;  %s1291_s0 = inlined_call_operand.vmem [shape: f32[8,32], index: 0, kind: input, shape index: {}]   ;;  %s1292_s1 = inlined_call_operand.vmem [shape: f32[1,32], index: 1, kind: input, shape index: {}]   ;;  %s1293_s2 = inlined_call_operand.vmem [shape: f32[32,96], index: 2, kind: input, shape index: {}]   ;;  %s1294_s3 = inlined_call_operand.vmem [shape: f32[1,96], index: 3, kind: input, shape index: {}]   ;;  %s1295_s4 = inlined_call_operand.vmem [shape: f32[32,128], index: 4, kind: input, shape index: {}]   ;;  %s1296_s5 = inlined_call_operand.vmem [shape: f32[1,128], index: 5, kind: input, shape index: {}]   ;;  %s1297_s6 = inlined_call_operand.hbm [shape: f32[8,32], index: 6, kind: output, shape index: {0}]   ;;  %s1298_s7 = inlined_call_operand.hbm [shape: f32[1,32], index: 7, kind: output, shape index: {1}]  }
   0x1   :  { %v30_v0 = vld [vmem:[%s1295_s4 + $0x18] sm:$0xff]  ;;  %v29_v1 = vld [vmem:[%s1295_s4 + $0x10] sm:$0xff]  ;;  %v28_v3 = vld [vmem:[%s1295_s4 + $0x8] sm:$0xff] }
   0x2   :  { %56 = vmatpush.msra.mxu0 %v30_v0  ;;  %v69_v2 = vld [vmem:[%s1293_s2 + $0x18] sm:$0xff]  ;;  %162 = vmatpush.msra.mxu2 %v30_v0  ;;  %v68_v4 = vld [vmem:[%s1293_s2 + $0x10] sm:$0xff]  ;;  %v67_v5 = vld [vmem:[%s1293_s2 + $0x8] sm:$0xff] }
   0x3   :  { %90 = vmatpush.msra.mxu1 %v69_v2  ;;  %255 = vmatpush.msra.mxu3 %v30_v0  ;;  %v27_v6 = vld [vmem:[%s1295_s4] sm:$0xff] }
   0x4   :  { %57 = vmatpush.msra.mxu0 %v29_v1  ;;  %163 = vmatpush.msra.mxu2 %v29_v1 }
   0x5   :  { %91 = vmatpush.msra.mxu1 %v68_v4  ;;  %256 = vmatpush.msra.mxu3 %v29_v1 }
   0x6   :  { %14 = vsyncpa [#allocation7], 0  ;;  %58 = vmatpush.msra.mxu0 %v28_v3  ;;  %v39_v7 = vld [vmem:[%s1292_s1] sm:$0x1]  ;;  %vm40_vm0 = vcmask 261120   ;;  %164 = vmatpush.msra.mxu2 %v28_v3  ;;  %s1031_s4 = smov 64  }
   0x7   :  { %v66_v8 = vld [vmem:[%s1293_s2] sm:$0xff]  ;;  %92 = vmatpush.msra.mxu1 %v67_v5  ;;  %257 = vmatpush.msra.mxu3 %v28_v3  ;;  %vm37_vm5 = vcmask 253952   ;;  %s1032_s23 = smov 96   ;;  %s1033_s24 = smov 32  }
   0x8   :  { %v65_v9 = vld [vmem:[%s1291_s0] sm:$0xff]  ;;  %59 = vmatpush.msra.mxu0 %v27_v6  ;;  %165 = vmatpush.msra.mxu2 %v27_v6  ;;  %s859_s28 = sshll.u32 %s1298_s7, 4  ;;  %s1035_s29 = smov [#allocation4]   ;;  %s860_s28 = int_to_ptr.hbm [resolvable:$true] %s859_s28 }
   0x9   :  { %873 = vmatmul.msk.f32.vlgmr.msra.gmra.mxu0 %vm40_vm0, %v39_v7  ;;  %93 = vmatpush.msra.mxu1 %v66_v8  ;;  %v1111_v10 = vld [vmem:[%s1296_s5] sm:$0x1]  ;;  %s846_s30 = sshll.u32 %s1035_s29, 4  ;;  %s848_s9 = sshll.u32 %s1297_s6, 4  ;;  %s847_s30 = int_to_ptr.vmem [resolvable:$true] %s846_s30  ;;  %s849_s9 = int_to_ptr.hbm [resolvable:$true] %s848_s9 }
   0xa   :  { %874 = vmatmul.msk.f32.vlgmr.msra.gmra.mxu1 %vm40_vm0, %v65_v9  ;;  %258 = vmatpush.msra.mxu3 %v27_v6  ;;  %v896_v14 = vld [vmem:[%s1294_s3] ss:$0 sm:$0xff] }
   0xb   :  { %346 = vmatpush.msrb.mxu0 %v30_v0  ;;  %437 = vmatpush.msrb.mxu1 %v30_v0  ;;  %v36_v34 = vld [vmem:[%s1292_s1] sm:$0x1]  ;;  %s1034_s1 = smov [#allocation6]  }
   0xc   :  { %528 = vmatpush.msrb.mxu2 %v30_v0  ;;  %619 = vmatpush.msrb.mxu3 %v30_v0  ;;  %38 = vst.msk [vmem:[#allocation2] sm:$0x1] %vm37_vm5, %v36_v34  ;;  %s857_s25 = sshll.u32 %s1034_s1, 4  ;;  %s858_s25 = int_to_ptr.vmem [resolvable:$true] %s857_s25 }
   0xd   :  { %347 = vmatpush.msrb.mxu0 %v29_v1  ;;  %438 = vmatpush.msrb.mxu1 %v29_v1 }
   0xe   :  { %529 = vmatpush.msrb.mxu2 %v29_v1  ;;  %620 = vmatpush.msrb.mxu3 %v29_v1 }
   0xf   :  { %348 = vmatpush.msrb.mxu0 %v28_v3  ;;  %439 = vmatpush.msrb.mxu1 %v28_v3 }
  0x10   :  { %530 = vmatpush.msrb.mxu2 %v28_v3  ;;  %621 = vmatpush.msrb.mxu3 %v28_v3 }
  0x11   :  { %349 = vmatpush.msrb.mxu0 %v27_v6  ;;  %440 = vmatpush.msrb.mxu1 %v27_v6 }
  0x12   :  { %531 = vmatpush.msrb.mxu2 %v27_v6  ;;  %622 = vmatpush.msrb.mxu3 %v27_v6 }
  0x13   :  { %710 = vmatpush.msra.mxu0 %v30_v0  ;;  %801 = vmatpush.msra.mxu1 %v30_v0  ;;  %v898_v38 = vld [vmem:[#allocation2] ss:$0 sm:$0xff] }
  0x15   :  { %711 = vmatpush.msra.mxu0 %v29_v1  ;;  %802 = vmatpush.msra.mxu1 %v29_v1 }
  0x17   :  { %712 = vmatpush.msra.mxu0 %v28_v3  ;;  %803 = vmatpush.msra.mxu1 %v28_v3 }
  0x19   :  { %713 = vmatpush.msra.mxu0 %v27_v6  ;;  %804 = vmatpush.msra.mxu1 %v27_v6 }
  0x86   :  { %v61_v11 = vpop.f32.mrf.mxu0 }
  0x87   :  { %v62_v12 = vadd.f32 %v61_v11, %v1111_v10  ;;  %v95_v15 = vpop.f32.mrf.mxu1 }
  0x88   :  { %v1118_v16 = vadd.f32 %v896_v14, %v95_v15 }
  0x89   :  { %64 = vst [vmem:[#allocation3] sm:$0x1] %v62_v12 }
  0x90   :  { %v897_v13 = vld [vmem:[#allocation3] ss:$0 sm:$0xff] }
  0x91   :  { %122 = vrot.lane.b32.xlu0 %v897_v13, %s1031_s4  ;;  %v99_v17 = vld [vmem:[#allocation3] sm:$0x1] }
  0x92   :  { %v100_v18 = vadd.f32 %v99_v17, %v1118_v16 }
  0x94   :  { %v875_v19 = vmul.f32 -1.442695, %v100_v18 }
  0x96   :  { %899 = vpow2.f32 %v875_v19 }
  0x9c   :  { %v900_v20 = vpop.eup %899 }
  0x9d   :  { %v104_v21 = vadd.f32 1.0, %v900_v20 }
  0x9f   :  { %901 = vrcp.f32 %v104_v21  ;;  %v116_v27 = vand.u32 2147483648, %v104_v21  ;;  %vm110_vm2 = vweird.f32 %v104_v21  ;;  %v114_v28 = vand.u32 2147483647, %v104_v21 }
  0xa1   :  { %v117_v30 = vor.u32 1.1754944e-38, %v116_v27  ;;  %vm115_vm4 = vcmp.eq.f32.partialorder %v114_v28, 8.507059e+37 }
  0xa5   :  { %v902_v22 = vpop.eup %901 }
  0xa6   :  { %v106_v23 = vmul.f32 %v902_v22, %v104_v21  ;;  %vm111_vm1 = vweird.f32 %v902_v22 }
  0xa7   :  { %vm112_vm3 = vmor %vm110_vm2, %vm111_vm1 }
  0xa8   :  { %v107_v24 = vsub.f32 1.0, %v106_v23 }
  0xaa   :  { %v108_v25 = vmul.f32 %v902_v22, %v107_v24 }
  0xac   :  { %v109_v26 = vadd.f32 %v902_v22, %v108_v25 }
  0xae   :  { %v113_v29 = vsel %vm112_vm3, %v902_v22, %v109_v26 }
  0xaf   :  { %v118_v32 = vsel %vm115_vm4, %v117_v30, %v113_v29 }
  0xb0   :  { %v132_v40 = vsub.f32 1.0, %v118_v32 }
 0x103   :  { %v123_v31 = vpop.permute.xlu0 %122 }
 0x104   :  { %v125_v33 = vmul.f32 %v123_v31, %v118_v32 }
 0x106   :  { %127 = vrot.lane.b32.xlu0 %v125_v33, %s1031_s4 }
 0x178   :  { %v128_v35 = vpop.permute.xlu0 %127 }
 0x179   :  { %v130_v36 = vadd.f32 %v128_v35, %v1118_v16 }
 0x17b   :  { %903 = vtanh.f32 %v130_v36 }
 0x181   :  { %v904_v37 = vpop.eup %903 }
 0x182   :  { %134 = vrot.lane.b32.xlu1 %v904_v37, %s1032_s23 }
 0x18a   :  { %140 = vrot.lane.b32.xlu1 %v898_v38, %s1033_s24 }
 0x1f4   :  { %v135_v39 = vpop.permute.xlu1 %134 }
 0x1f5   :  { %v137_v42 = vmul.f32 %v135_v39, %v132_v40 }
 0x1fc   :  { %v141_v41 = vpop.permute.xlu1 %140 }
 0x1fd   :  { %v143_v43 = vmul.f32 %v141_v41, %v118_v32 }
 0x1ff   :  { %v144_v44 = vadd.f32 %v143_v43, %v137_v42 }
 0x201   :  { %146 = vrot.lane.b32.xlu2 %v144_v44, %s1032_s23  ;;  %v233_v61 = vrot.slane %v144_v44, 7 }
 0x25b   :  { %v147_v45 = vpop.permute.xlu2 %146 }
 0x25c   :  { %876 = vmatmul.msk.f32.vlgmr.msra.gmra.mxu2 %vm40_vm0, %v147_v45 }
 0x2df   :  { %v167_v46 = vpop.f32.mrf.mxu2 }
 0x2e0   :  { %v1132_v47 = vadd.f32 %v167_v46, %v1111_v10 }
 0x2e2   :  { %v195_v48 = vrot.slane %v1132_v47, 7 }
 0x2e4   :  { %217 = vrot.lane.b32.xlu2 %v195_v48, %s1031_s4  ;;  %v197_v49 = vadd.f32 %v195_v48, %v1118_v16 }
 0x2e6   :  { %v877_v50 = vmul.f32 -1.442695, %v197_v49 }
 0x2e8   :  { %905 = vpow2.f32 %v877_v50 }
 0x2ee   :  { %v906_v51 = vpop.eup %905 }
 0x2ef   :  { %v201_v52 = vadd.f32 1.0, %v906_v51 }
 0x2f1   :  { %907 = vrcp.f32 %v201_v52  ;;  %v213_v56 = vand.u32 2147483648, %v201_v52  ;;  %v211_v58 = vand.u32 2147483647, %v201_v52  ;;  %vm207_vm7 = vweird.f32 %v201_v52 }
 0x2f3   :  { %v214_v60 = vor.u32 1.1754944e-38, %v213_v56  ;;  %vm212_vm9 = vcmp.eq.f32.partialorder %v211_v58, 8.507059e+37 }
 0x2f7   :  { %v908_v53 = vpop.eup %907 }
 0x2f8   :  { %v203_v54 = vmul.f32 %v908_v53, %v201_v52  ;;  %vm208_vm6 = vweird.f32 %v908_v53 }
 0x2f9   :  { %vm209_vm8 = vmor %vm207_vm7, %vm208_vm6 }
 0x2fa   :  { %v204_v55 = vsub.f32 1.0, %v203_v54 }
 0x2fc   :  { %v205_v57 = vmul.f32 %v908_v53, %v204_v55 }
 0x2fe   :  { %v206_v59 = vadd.f32 %v908_v53, %v205_v57 }
 0x300   :  { %v210_v62 = vsel %vm209_vm8, %v908_v53, %v206_v59 }
 0x301   :  { %v215_v63 = vsel %vm212_vm9, %v214_v60, %v210_v62 }
 0x302   :  { %v235_v0 = vmul.f32 %v233_v61, %v215_v63  ;;  %v227_v6 = vsub.f32 1.0, %v215_v63 }
 0x33e   :  { %v218_v1 = vpop.permute.xlu2 %217 }
 0x33f   :  { %v220_v2 = vmul.f32 %v218_v1, %v215_v63 }
 0x341   :  { %222 = vrot.lane.b32.xlu0 %v220_v2, %s1031_s4 }
 0x3b3   :  { %v223_v3 = vpop.permute.xlu0 %222 }
 0x3b4   :  { %v225_v4 = vadd.f32 %v223_v3, %v1118_v16 }
 0x3b6   :  { %909 = vtanh.f32 %v225_v4 }
 0x3bc   :  { %v910_v5 = vpop.eup %909 }
 0x3bd   :  { %229 = vrot.lane.b32.xlu1 %v910_v5, %s1032_s23 }
 0x42f   :  { %v230_v7 = vpop.permute.xlu1 %229 }
 0x430   :  { %v232_v8 = vmul.f32 %v230_v7, %v227_v6 }
 0x432   :  { %v236_v9 = vadd.f32 %v235_v0, %v232_v8 }
 0x434   :  { %v238_v11 = vrot.slane %v236_v9, 1  ;;  %v324_v36 = vrot.slane %v236_v9, 7 }
 0x436   :  { %239 = vrot.lane.b32.xlu2 %v238_v11, %s1032_s23 }
 0x490   :  { %v240_v12 = vpop.permute.xlu2 %239 }
 0x491   :  { %878 = vmatmul.msk.f32.vlgmr.msra.gmra.mxu3 %vm40_vm0, %v240_v12 }
 0x514   :  { %v260_v13 = vpop.f32.mrf.mxu3 }
 0x515   :  { %v1143_v14 = vadd.f32 %v260_v13, %v1111_v10 }
 0x517   :  { %v286_v15 = vrot.slane %v1143_v14, 6 }
 0x519   :  { %308 = vrot.lane.b32.xlu0 %v286_v15, %s1031_s4  ;;  %v288_v17 = vadd.f32 %v286_v15, %v1118_v16 }
 0x51b   :  { %v879_v18 = vmul.f32 -1.442695, %v288_v17 }
 0x51d   :  { %911 = vpow2.f32 %v879_v18 }
 0x523   :  { %v912_v19 = vpop.eup %911 }
 0x524   :  { %v292_v20 = vadd.f32 1.0, %v912_v19 }
 0x526   :  { %913 = vrcp.f32 %v292_v20  ;;  %v304_v26 = vand.u32 2147483648, %v292_v20  ;;  %vm298_vm11 = vweird.f32 %v292_v20  ;;  %v302_v27 = vand.u32 2147483647, %v292_v20 }
 0x528   :  { %v305_v29 = vor.u32 1.1754944e-38, %v304_v26  ;;  %vm303_vm13 = vcmp.eq.f32.partialorder %v302_v27, 8.507059e+37 }
 0x52c   :  { %v914_v21 = vpop.eup %913 }
 0x52d   :  { %v294_v22 = vmul.f32 %v914_v21, %v292_v20  ;;  %vm299_vm10 = vweird.f32 %v914_v21 }
 0x52e   :  { %vm300_vm12 = vmor %vm298_vm11, %vm299_vm10 }
 0x52f   :  { %v295_v23 = vsub.f32 1.0, %v294_v22 }
 0x531   :  { %v296_v24 = vmul.f32 %v914_v21, %v295_v23 }
 0x533   :  { %v297_v25 = vadd.f32 %v914_v21, %v296_v24 }
 0x535   :  { %v301_v28 = vsel %vm300_vm12, %v914_v21, %v297_v25 }
 0x536   :  { %v306_v31 = vsel %vm303_vm13, %v305_v29, %v301_v28 }
 0x537   :  { %v318_v37 = vsub.f32 1.0, %v306_v31  ;;  %v326_v39 = vmul.f32 %v324_v36, %v306_v31 }
 0x58b   :  { %v309_v30 = vpop.permute.xlu0 %308 }
 0x58c   :  { %v311_v32 = vmul.f32 %v309_v30, %v306_v31 }
 0x58e   :  { %313 = vrot.lane.b32.xlu1 %v311_v32, %s1031_s4 }
 0x600   :  { %v314_v33 = vpop.permute.xlu1 %313 }
 0x601   :  { %v316_v34 = vadd.f32 %v314_v33, %v1118_v16 }
 0x603   :  { %915 = vtanh.f32 %v316_v34 }
 0x609   :  { %v916_v35 = vpop.eup %915 }
 0x60a   :  { %320 = vrot.lane.b32.xlu2 %v916_v35, %s1032_s23 }
 0x664   :  { %v321_v38 = vpop.permute.xlu2 %320 }
 0x665   :  { %v323_v40 = vmul.f32 %v321_v38, %v318_v37 }
 0x667   :  { %v327_v41 = vadd.f32 %v326_v39, %v323_v40 }
 0x669   :  { %v329_v42 = vrot.slane %v327_v41, 2  ;;  %v415_v3 = vrot.slane %v327_v41, 7 }
 0x66b   :  { %330 = vrot.lane.b32.xlu0 %v329_v42, %s1032_s23 }
 0x6dd   :  { %v331_v43 = vpop.permute.xlu0 %330 }
 0x6de   :  { %880 = vmatmul.msk.f32.vlgmr.msrb.gmra.mxu0 %vm40_vm0, %v331_v43 }
 0x75b   :  { %v351_v44 = vpop.f32.mrf.mxu0 }
 0x75c   :  { %v1154_v45 = vadd.f32 %v351_v44, %v1111_v10 }
 0x75e   :  { %v377_v46 = vrot.slane %v1154_v45, 5 }
 0x760   :  { %399 = vrot.lane.b32.xlu1 %v377_v46, %s1031_s4  ;;  %v379_v48 = vadd.f32 %v377_v46, %v1118_v16 }
 0x762   :  { %v881_v49 = vmul.f32 -1.442695, %v379_v48 }
 0x764   :  { %917 = vpow2.f32 %v881_v49 }
 0x76a   :  { %v918_v50 = vpop.eup %917 }
 0x76b   :  { %v383_v51 = vadd.f32 1.0, %v918_v50 }
 0x76d   :  { %919 = vrcp.f32 %v383_v51  ;;  %v395_v57 = vand.u32 2147483648, %v383_v51  ;;  %vm389_vm15 = vweird.f32 %v383_v51  ;;  %v393_v58 = vand.u32 2147483647, %v383_v51 }
 0x76f   :  { %v396_v60 = vor.u32 1.1754944e-38, %v395_v57  ;;  %vm394_vm2 = vcmp.eq.f32.partialorder %v393_v58, 8.507059e+37 }
 0x773   :  { %v920_v52 = vpop.eup %919 }
 0x774   :  { %v385_v53 = vmul.f32 %v920_v52, %v383_v51  ;;  %vm390_vm14 = vweird.f32 %v920_v52 }
 0x775   :  { %vm391_vm1 = vmor %vm389_vm15, %vm390_vm14 }
 0x776   :  { %v386_v54 = vsub.f32 1.0, %v385_v53 }
 0x778   :  { %v387_v55 = vmul.f32 %v920_v52, %v386_v54 }
 0x77a   :  { %v388_v56 = vadd.f32 %v920_v52, %v387_v55 }
 0x77c   :  { %v392_v59 = vsel %vm391_vm1, %v920_v52, %v388_v56 }
 0x77d   :  { %v397_v62 = vsel %vm394_vm2, %v396_v60, %v392_v59 }
 0x77e   :  { %v409_v4 = vsub.f32 1.0, %v397_v62  ;;  %v417_v6 = vmul.f32 %v415_v3, %v397_v62 }
 0x7d2   :  { %v400_v61 = vpop.permute.xlu1 %399 }
 0x7d3   :  { %v402_v63 = vmul.f32 %v400_v61, %v397_v62 }
 0x7d5   :  { %404 = vrot.lane.b32.xlu2 %v402_v63, %s1031_s4 }
 0x82f   :  { %v405_v0 = vpop.permute.xlu2 %404 }
 0x830   :  { %v407_v1 = vadd.f32 %v405_v0, %v1118_v16 }
 0x832   :  { %921 = vtanh.f32 %v407_v1 }
 0x838   :  { %v922_v2 = vpop.eup %921 }
 0x839   :  { %411 = vrot.lane.b32.xlu0 %v922_v2, %s1032_s23 }
 0x8ab   :  { %v412_v5 = vpop.permute.xlu0 %411 }
 0x8ac   :  { %v414_v7 = vmul.f32 %v412_v5, %v409_v4 }
 0x8ae   :  { %v418_v8 = vadd.f32 %v417_v6, %v414_v7 }
 0x8b0   :  { %v420_v9 = vrot.slane %v418_v8, 3  ;;  %v506_v29 = vrot.slane %v418_v8, 7 }
 0x8b2   :  { %421 = vrot.lane.b32.xlu1 %v420_v9, %s1032_s23 }
 0x924   :  { %v422_v11 = vpop.permute.xlu1 %421 }
 0x925   :  { %882 = vmatmul.msk.f32.vlgmr.msrb.gmra.mxu1 %vm40_vm0, %v422_v11 }
 0x9a2   :  { %v442_v12 = vpop.f32.mrf.mxu1 }
 0x9a3   :  { %v1165_v13 = vadd.f32 %v442_v12, %v1111_v10 }
 0x9a5   :  { %v468_v15 = vrot.slane %v1165_v13, 4 }
 0x9a7   :  { %490 = vrot.lane.b32.xlu2 %v468_v15, %s1031_s4  ;;  %v470_v17 = vadd.f32 %v468_v15, %v1118_v16 }
 0x9a9   :  { %v883_v18 = vmul.f32 -1.442695, %v470_v17 }
 0x9ab   :  { %923 = vpow2.f32 %v883_v18 }
 0x9b1   :  { %v924_v19 = vpop.eup %923 }
 0x9b2   :  { %v474_v20 = vadd.f32 1.0, %v924_v19 }
 0x9b4   :  { %925 = vrcp.f32 %v474_v20  ;;  %v486_v24 = vand.u32 2147483648, %v474_v20  ;;  %v484_v26 = vand.u32 2147483647, %v474_v20  ;;  %vm480_vm4 = vweird.f32 %v474_v20 }
 0x9b6   :  { %v487_v28 = vor.u32 1.1754944e-38, %v486_v24  ;;  %vm485_vm7 = vcmp.eq.f32.partialorder %v484_v26, 8.507059e+37 }
 0x9ba   :  { %v926_v21 = vpop.eup %925 }
 0x9bb   :  { %v476_v22 = vmul.f32 %v926_v21, %v474_v20  ;;  %vm481_vm3 = vweird.f32 %v926_v21 }
 0x9bc   :  { %vm482_vm6 = vmor %vm480_vm4, %vm481_vm3 }
 0x9bd   :  { %v477_v23 = vsub.f32 1.0, %v476_v22 }
 0x9bf   :  { %v478_v25 = vmul.f32 %v926_v21, %v477_v23 }
 0x9c1   :  { %v479_v27 = vadd.f32 %v926_v21, %v478_v25 }
 0x9c3   :  { %v483_v30 = vsel %vm482_vm6, %v926_v21, %v479_v27  ;;  %vm170_vm6 = vcmask 1041152  }
 0x9c4   :  { %v488_v31 = vsel %vm485_vm7, %v487_v28, %v483_v30 }
 0x9c5   :  { %v508_v32 = vmul.f32 %v506_v29, %v488_v31  ;;  %v500_v38 = vsub.f32 1.0, %v488_v31 }
 0xa01   :  { %v491_v33 = vpop.permute.xlu2 %490 }
 0xa02   :  { %v493_v34 = vmul.f32 %v491_v33, %v488_v31 }
 0xa04   :  { %495 = vrot.lane.b32.xlu0 %v493_v34, %s1031_s4 }
 0xa76   :  { %v496_v35 = vpop.permute.xlu0 %495 }
 0xa77   :  { %v498_v36 = vadd.f32 %v496_v35, %v1118_v16 }
 0xa79   :  { %927 = vtanh.f32 %v498_v36 }
 0xa7f   :  { %v928_v37 = vpop.eup %927 }
 0xa80   :  { %502 = vrot.lane.b32.xlu1 %v928_v37, %s1032_s23 }
 0xaf2   :  { %v503_v39 = vpop.permute.xlu1 %502 }
 0xaf3   :  { %v505_v40 = vmul.f32 %v503_v39, %v500_v38 }
 0xaf5   :  { %v509_v41 = vadd.f32 %v508_v32, %v505_v40 }
 0xaf7   :  { %v511_v42 = vrot.slane %v509_v41, 4  ;;  %v597_v4 = vrot.slane %v509_v41, 7 }
 0xaf9   :  { %512 = vrot.lane.b32.xlu2 %v511_v42, %s1032_s23 }
 0xb53   :  { %v513_v43 = vpop.permute.xlu2 %512 }
 0xb54   :  { %884 = vmatmul.msk.f32.vlgmr.msrb.gmra.mxu2 %vm40_vm0, %v513_v43 }
 0xbd7   :  { %v533_v44 = vpop.f32.mrf.mxu2 }
 0xbd8   :  { %v1176_v46 = vadd.f32 %v533_v44, %v1111_v10 }
 0xbda   :  { %v559_v48 = vrot.slane %v1176_v46, 3 }
 0xbdc   :  { %581 = vrot.lane.b32.xlu0 %v559_v48, %s1031_s4  ;;  %v561_v49 = vadd.f32 %v559_v48, %v1118_v16 }
 0xbde   :  { %v885_v50 = vmul.f32 -1.442695, %v561_v49 }
 0xbe0   :  { %929 = vpow2.f32 %v885_v50 }
 0xbe6   :  { %v930_v51 = vpop.eup %929 }
 0xbe7   :  { %v565_v52 = vadd.f32 1.0, %v930_v51 }
 0xbe9   :  { %931 = vrcp.f32 %v565_v52  ;;  %v577_v58 = vand.u32 2147483648, %v565_v52  ;;  %vm571_vm9 = vweird.f32 %v565_v52  ;;  %v575_v59 = vand.u32 2147483647, %v565_v52 }
 0xbeb   :  { %v578_v61 = vor.u32 1.1754944e-38, %v577_v58  ;;  %vm576_vm11 = vcmp.eq.f32.partialorder %v575_v59, 8.507059e+37 }
 0xbef   :  { %v932_v53 = vpop.eup %931 }
 0xbf0   :  { %v567_v54 = vmul.f32 %v932_v53, %v565_v52  ;;  %vm572_vm8 = vweird.f32 %v932_v53 }
 0xbf1   :  { %vm573_vm10 = vmor %vm571_vm9, %vm572_vm8 }
 0xbf2   :  { %v568_v55 = vsub.f32 1.0, %v567_v54 }
 0xbf4   :  { %v569_v56 = vmul.f32 %v932_v53, %v568_v55 }
 0xbf6   :  { %v570_v57 = vadd.f32 %v932_v53, %v569_v56 }
 0xbf8   :  { %v574_v60 = vsel %vm573_vm10, %v932_v53, %v570_v57 }
 0xbf9   :  { %v579_v63 = vsel %vm576_vm11, %v578_v61, %v574_v60 }
 0xbfa   :  { %v591_v5 = vsub.f32 1.0, %v579_v63  ;;  %v599_v7 = vmul.f32 %v597_v4, %v579_v63 }
 0xc4e   :  { %v582_v62 = vpop.permute.xlu0 %581 }
 0xc4f   :  { %v584_v0 = vmul.f32 %v582_v62, %v579_v63 }
 0xc51   :  { %586 = vrot.lane.b32.xlu1 %v584_v0, %s1031_s4 }
 0xcc3   :  { %v587_v1 = vpop.permute.xlu1 %586 }
 0xcc4   :  { %v589_v2 = vadd.f32 %v587_v1, %v1118_v16 }
 0xcc6   :  { %933 = vtanh.f32 %v589_v2 }
 0xccc   :  { %v934_v3 = vpop.eup %933 }
 0xccd   :  { %593 = vrot.lane.b32.xlu2 %v934_v3, %s1032_s23 }
 0xd27   :  { %v594_v6 = vpop.permute.xlu2 %593 }
 0xd28   :  { %v596_v8 = vmul.f32 %v594_v6, %v591_v5  ;;  %v171_v6 = vsel %vm170_vm6, %v1132_v47, -inf }
 0xd2a   :  { %v600_v9 = vadd.f32 %v599_v7, %v596_v8 }
 0xd2c   :  { %v602_v11 = vrot.slane %v600_v9, 5  ;;  %v688_v38 = vrot.slane %v600_v9, 7 }
 0xd2e   :  { %603 = vrot.lane.b32.xlu0 %v602_v11, %s1032_s23 }
 0xda0   :  { %v604_v12 = vpop.permute.xlu0 %603 }
 0xda1   :  { %886 = vmatmul.msk.f32.vlgmr.msrb.gmra.mxu3 %vm40_vm0, %v604_v12 }
 0xe24   :  { %v624_v15 = vpop.f32.mrf.mxu3 }
 0xe25   :  { %v1187_v17 = vadd.f32 %v624_v15, %v1111_v10 }
 0xe27   :  { %v650_v18 = vrot.slane %v1187_v17, 2 }
 0xe29   :  { %672 = vrot.lane.b32.xlu1 %v650_v18, %s1031_s4  ;;  %v652_v19 = vadd.f32 %v650_v18, %v1118_v16 }
 0xe2b   :  { %v887_v20 = vmul.f32 -1.442695, %v652_v19 }
 0xe2d   :  { %935 = vpow2.f32 %v887_v20 }
 0xe33   :  { %v936_v21 = vpop.eup %935 }
 0xe34   :  { %v656_v22 = vadd.f32 1.0, %v936_v21 }
 0xe36   :  { %937 = vrcp.f32 %v656_v22  ;;  %v668_v28 = vand.u32 2147483648, %v656_v22  ;;  %vm662_vm13 = vweird.f32 %v656_v22  ;;  %v666_v29 = vand.u32 2147483647, %v656_v22 }
 0xe38   :  { %v669_v31 = vor.u32 1.1754944e-38, %v668_v28  ;;  %vm667_vm15 = vcmp.eq.f32.partialorder %v666_v29, 8.507059e+37 }
 0xe3c   :  { %v938_v23 = vpop.eup %937 }
 0xe3d   :  { %v658_v24 = vmul.f32 %v938_v23, %v656_v22  ;;  %vm663_vm12 = vweird.f32 %v938_v23 }
 0xe3e   :  { %vm664_vm14 = vmor %vm662_vm13, %vm663_vm12 }
 0xe3f   :  { %v659_v25 = vsub.f32 1.0, %v658_v24 }
 0xe41   :  { %v660_v26 = vmul.f32 %v938_v23, %v659_v25 }
 0xe43   :  { %v661_v27 = vadd.f32 %v938_v23, %v660_v26 }
 0xe45   :  { %v665_v30 = vsel %vm664_vm14, %v938_v23, %v661_v27 }
 0xe46   :  { %v670_v33 = vsel %vm667_vm15, %v669_v31, %v665_v30  ;;  %v263_v31 = vsel %vm170_vm6, %v1143_v14, -inf }
 0xe47   :  { %v682_v39 = vsub.f32 1.0, %v670_v33  ;;  %v690_v41 = vmul.f32 %v688_v38, %v670_v33 }
 0xe9b   :  { %v673_v32 = vpop.permute.xlu1 %672 }
 0xe9c   :  { %v675_v34 = vmul.f32 %v673_v32, %v670_v33 }
 0xe9e   :  { %677 = vrot.lane.b32.xlu2 %v675_v34, %s1031_s4  ;;  %v354_v34 = vsel %vm170_vm6, %v1154_v45, -inf }
 0xef8   :  { %v678_v35 = vpop.permute.xlu2 %677 }
 0xef9   :  { %v680_v36 = vadd.f32 %v678_v35, %v1118_v16 }
 0xefb   :  { %939 = vtanh.f32 %v680_v36 }
 0xf01   :  { %v940_v37 = vpop.eup %939 }
 0xf02   :  { %684 = vrot.lane.b32.xlu0 %v940_v37, %s1032_s23 }
 0xf74   :  { %v685_v40 = vpop.permute.xlu0 %684 }
 0xf75   :  { %v687_v42 = vmul.f32 %v685_v40, %v682_v39 }
 0xf77   :  { %v691_v43 = vadd.f32 %v690_v41, %v687_v42  ;;  %v445_v42 = vsel %vm170_vm6, %v1165_v13, -inf }
 0xf79   :  { %v693_v44 = vrot.slane %v691_v43, 6  ;;  %v779_v0 = vrot.slane %v691_v43, 7  ;;  %v627_v43 = vsel %vm170_vm6, %v1187_v17, -inf }
 0xf7b   :  { %694 = vrot.lane.b32.xlu1 %v693_v44, %s1032_s23 }
 0xfed   :  { %v695_v48 = vpop.permute.xlu1 %694 }
 0xfee   :  { %888 = vmatmul.msk.f32.vlgmr.msra.gmra.mxu0 %vm40_vm0, %v695_v48 }
0x106b   :  { %v715_v49 = vpop.f32.mrf.mxu0 }
0x106c   :  { %v1198_v50 = vadd.f32 %v715_v49, %v1111_v10 }
0x106e   :  { %v741_v51 = vrot.slane %v1198_v50, 1 }
0x1070   :  { %763 = vrot.lane.b32.xlu2 %v741_v51, %s1031_s4  ;;  %v743_v52 = vadd.f32 %v741_v51, %v1118_v16 }
0x1072   :  { %v889_v53 = vmul.f32 -1.442695, %v743_v52 }
0x1074   :  { %941 = vpow2.f32 %v889_v53 }
0x107a   :  { %v942_v54 = vpop.eup %941 }
0x107b   :  { %v747_v55 = vadd.f32 1.0, %v942_v54 }
0x107d   :  { %943 = vrcp.f32 %v747_v55  ;;  %v759_v59 = vand.u32 2147483648, %v747_v55  ;;  %v757_v61 = vand.u32 2147483647, %v747_v55  ;;  %vm753_vm2 = vweird.f32 %v747_v55 }
0x107f   :  { %v760_v63 = vor.u32 1.1754944e-38, %v759_v59  ;;  %vm758_vm4 = vcmp.eq.f32.partialorder %v757_v61, 8.507059e+37 }
0x1083   :  { %v944_v56 = vpop.eup %943 }
0x1084   :  { %v749_v57 = vmul.f32 %v944_v56, %v747_v55  ;;  %vm754_vm1 = vweird.f32 %v944_v56 }
0x1085   :  { %vm755_vm3 = vmor %vm753_vm2, %vm754_vm1 }
0x1086   :  { %v750_v58 = vsub.f32 1.0, %v749_v57 }
0x1088   :  { %v751_v60 = vmul.f32 %v944_v56, %v750_v58 }
0x108a   :  { %v752_v62 = vadd.f32 %v944_v56, %v751_v60 }
0x108c   :  { %v756_v1 = vsel %vm755_vm3, %v944_v56, %v752_v62  ;;  %v536_v62 = vsel %vm170_vm6, %v1176_v46, -inf }
0x108d   :  { %v761_v2 = vsel %vm758_vm4, %v760_v63, %v756_v1 }
0x108e   :  { %v781_v3 = vmul.f32 %v779_v0, %v761_v2  ;;  %v773_v19 = vsub.f32 1.0, %v761_v2 }
0x10ca   :  { %v764_v4 = vpop.permute.xlu2 %763 }
0x10cb   :  { %v766_v5 = vmul.f32 %v764_v4, %v761_v2 }
0x10cd   :  { %768 = vrot.lane.b32.xlu0 %v766_v5, %s1031_s4 }
0x10f7   :  { %172 = vmax.xlane.f32.xlu0 %v171_v6  ;;  %v718_v6 = vsel %vm170_vm6, %v1198_v50, -inf }
0x113f   :  { %v769_v7 = vpop.permute.xlu0 %768 }
0x1140   :  { %v771_v8 = vadd.f32 %v769_v7, %v1118_v16 }
0x1142   :  { %945 = vtanh.f32 %v771_v8 }
0x1148   :  { %v946_v9 = vpop.eup %945 }
0x1149   :  { %775 = vrot.lane.b32.xlu1 %v946_v9, %s1032_s23 }
0x116a   :  { %v173_v11 = vpop.xlane.xlu0 %172 }
0x116b   :  { %v174_v12 = vsub.f32 %v1132_v47, %v173_v11 }
0x116d   :  { %v175_v15 = vmul.f32 1.442695, %v174_v12 }
0x116f   :  { %947 = vpow2.f32 %v175_v15 }
0x1175   :  { %v948_v18 = vpop.eup %947 }
0x1176   :  { %178 = vrot.lane.b32.xlu1 %v948_v18, %s1033_s24 }
0x11bb   :  { %v776_v20 = vpop.permute.xlu1 %775 }
0x11bc   :  { %v778_v21 = vmul.f32 %v776_v20, %v773_v19 }
0x11be   :  { %v1210_v22 = vadd.f32 %v781_v3, %v778_v21 }
0x11c0   :  { %v784_v23 = vrot.slane %v1210_v22, 7 }
0x11c2   :  { %785 = vrot.lane.b32.xlu2 %v784_v23, %s1032_s23 }
0x11e8   :  { %v179_v16 = vpop.permute.xlu1 %178 }
0x11e9   :  { %v182_v24 = vsel %vm37_vm5, %v179_v16, 0.0 }
0x11eb   :  { %183 = vadd.xlane.f32.xlu2 %v182_v24 }
0x121c   :  { %v786_v25 = vpop.permute.xlu2 %785 }
0x121d   :  { %890 = vmatmul.msk.f32.vlgmr.msra.gmra.mxu1 %vm40_vm0, %v786_v25  ;;  %vm834_vm0 = vcmask 261127  }
0x125e   :  { %v184_v26 = vpop.xlane.xlu2 %183 }
0x125f   :  { %949 = vlog2.f32 %v184_v26 }
0x1265   :  { %v950_v27 = vpop.eup %949 }
0x1266   :  { %v186_v28 = vmul.f32 0.6931472, %v950_v27 }
0x1268   :  { %v187_v29 = vadd.f32 %v186_v28, %v173_v11 }
0x126a   :  { %v188_v30 = vsub.f32 %v1132_v47, %v187_v29 }
0x126c   :  { %190 = vrot.lane.b32.xlu1 %v188_v30, %s1033_s24 }
0x1296   :  { %264 = vmax.xlane.f32.xlu1 %v263_v31 }
0x129a   :  { %v806_v32 = vpop.f32.mrf.mxu1 }
0x129b   :  { %v1221_v33 = vadd.f32 %v806_v32, %v1111_v10 }
0x129d   :  { %836 = vst [vmem:[#allocation3] sm:$0x1] %v1221_v33  ;;  %v809_v44 = vsel %vm170_vm6, %v1221_v33, -inf }
0x129e   :  { %355 = vmax.xlane.f32.xlu1 %v354_v34 }
0x12de   :  { %v191_v35 = vpop.permute.xlu1 %190 }
0x12df   :  { %193 = vst.msk [vmem:[#allocation4] sm:$0x1] %vm37_vm5, %v191_v35 }
0x1309   :  { %v265_v47 = vpop.xlane.xlu1 %264 }
0x130a   :  { %v266_v36 = vsub.f32 %v1143_v14, %v265_v47 }
0x130c   :  { %v267_v37 = vmul.f32 1.442695, %v266_v36 }
0x130e   :  { %951 = vpow2.f32 %v267_v37 }
0x1311   :  { %v356_v38 = vpop.xlane.xlu1 %355 }
0x1312   :  { %v357_v39 = vsub.f32 %v1154_v45, %v356_v38 }
0x1314   :  { %v952_v40 = vpop.eup %951  ;;  %v358_v10 = vmul.f32 1.442695, %v357_v39 }
0x1315   :  { %270 = vrot.lane.b32.xlu2 %v952_v40, %s1033_s24 }
0x1316   :  { %953 = vpow2.f32 %v358_v10 }
0x131c   :  { %v954_v41 = vpop.eup %953 }
0x131d   :  { %361 = vrot.lane.b32.xlu2 %v954_v41, %s1033_s24 }
0x1346   :  { %446 = vmax.xlane.f32.xlu2 %v445_v42 }
0x134e   :  { %628 = vmax.xlane.f32.xlu2 %v627_v43 }
0x1356   :  { %810 = vmax.xlane.f32.xlu2 %v809_v44 }
0x136f   :  { %v271_v48 = vpop.permute.xlu2 %270 }
0x1370   :  { %v273_v49 = vsel %vm37_vm5, %v271_v48, 0.0 }
0x1371   :  { %274 = vadd.xlane.f32.xlu0 %v273_v49 }
0x1377   :  { %v362_v51 = vpop.permute.xlu2 %361 }
0x1378   :  { %v364_v52 = vsel %vm37_vm5, %v362_v51, 0.0 }
0x1379   :  { %365 = vadd.xlane.f32.xlu1 %v364_v52 }
0x13b9   :  { %v447_v53 = vpop.xlane.xlu2 %446 }
0x13ba   :  { %v448_v54 = vsub.f32 %v1165_v13, %v447_v53 }
0x13bc   :  { %v449_v55 = vmul.f32 1.442695, %v448_v54 }
0x13be   :  { %955 = vpow2.f32 %v449_v55 }
0x13c1   :  { %v629_v21 = vpop.xlane.xlu2 %628 }
0x13c2   :  { %v630_v29 = vsub.f32 %v1187_v17, %v629_v21 }
0x13c4   :  { %v956_v56 = vpop.eup %955  ;;  %v631_v30 = vmul.f32 1.442695, %v630_v29 }
0x13c5   :  { %452 = vrot.lane.b32.xlu1 %v956_v56, %s1033_s24 }
0x13c9   :  { %v811_v26 = vpop.xlane.xlu2 %810 }
0x13ca   :  { %v812_v35 = vsub.f32 %v1221_v33, %v811_v26 }
0x13cc   :  { %v813_v37 = vmul.f32 1.442695, %v812_v35 }
0x13e4   :  { %v275_v57 = vpop.xlane.xlu0 %274 }
0x13e5   :  { %957 = vlog2.f32 %v275_v57 }
0x13eb   :  { %v958_v58 = vpop.eup %957 }
0x13ec   :  { %v277_v59 = vmul.f32 0.6931472, %v958_v58  ;;  %v366_v60 = vpop.xlane.xlu1 %365 }
0x13ed   :  { %959 = vlog2.f32 %v366_v60 }
0x13ee   :  { %v278_v61 = vadd.f32 %v277_v59, %v265_v47 }
0x13ef   :  { %537 = vmax.xlane.f32.xlu1 %v536_v62 }
0x13f0   :  { %v279_v63 = vsub.f32 %v1143_v14, %v278_v61 }
0x13f2   :  { %281 = vrot.lane.b32.xlu0 %v279_v63, %s1033_s24 }
0x13f3   :  { %v960_v0 = vpop.eup %959 }
0x13f4   :  { %v368_v1 = vmul.f32 0.6931472, %v960_v0 }
0x13f6   :  { %v369_v2 = vadd.f32 %v368_v1, %v356_v38 }
0x13f8   :  { %v370_v3 = vsub.f32 %v1154_v45, %v369_v2 }
0x13fa   :  { %372 = vrot.lane.b32.xlu0 %v370_v3, %s1033_s24 }
0x1437   :  { %v453_v4 = vpop.permute.xlu1 %452 }
0x1438   :  { %v455_v5 = vsel %vm37_vm5, %v453_v4, 0.0 }
0x1439   :  { %456 = vadd.xlane.f32.xlu0 %v455_v5 }
0x1441   :  { %719 = vmax.xlane.f32.xlu0 %v718_v6 }
0x1462   :  { %v538_v7 = vpop.xlane.xlu1 %537 }
0x1463   :  { %v539_v14 = vsub.f32 %v1176_v46, %v538_v7 }
0x1464   :  { %v282_v8 = vpop.permute.xlu0 %281 }
0x1465   :  { %v540_v9 = vmul.f32 1.442695, %v539_v14  ;;  %284 = vst.msk [vmem:[#allocation4 + $0x1] sm:$0x1] %vm37_vm5, %v282_v8 }
0x1467   :  { %961 = vpow2.f32 %v540_v9 }
0x146c   :  { %v373_v11 = vpop.permute.xlu0 %372 }
0x146d   :  { %v962_v45 = vpop.eup %961  ;;  %375 = vst.msk [vmem:[#allocation4 + $0x2] sm:$0x1] %vm37_vm5, %v373_v11 }
0x146e   :  { %543 = vrot.lane.b32.xlu2 %v962_v45, %s1033_s24 }
0x14ac   :  { %v457_v12 = vpop.xlane.xlu0 %456 }
0x14ad   :  { %963 = vlog2.f32 %v457_v12 }
0x14b3   :  { %v964_v15 = vpop.eup %963 }
0x14b4   :  { %v459_v18 = vmul.f32 0.6931472, %v964_v15  ;;  %v1254_v19 = vpop.xlane.xlu0 %719 }
0x14b5   :  { %v721_v20 = vsub.f32 %v1198_v50, %v1254_v19 }
0x14b6   :  { %v460_v23 = vadd.f32 %v459_v18, %v447_v53 }
0x14b7   :  { %v722_v16 = vmul.f32 1.442695, %v721_v20 }
0x14b8   :  { %v461_v24 = vsub.f32 %v1165_v13, %v460_v23 }
0x14b9   :  { %965 = vpow2.f32 %v722_v16 }
0x14ba   :  { %463 = vrot.lane.b32.xlu0 %v461_v24, %s1033_s24  ;;  %967 = vpow2.f32 %v631_v30 }
0x14bf   :  { %v966_v25 = vpop.eup %965 }
0x14c0   :  { %725 = vrot.lane.b32.xlu2 %v966_v25, %s1033_s24  ;;  %v968_v31 = vpop.eup %967 }
0x14c8   :  { %v544_v27 = vpop.permute.xlu2 %543 }
0x14c9   :  { %v546_v28 = vsel %vm37_vm5, %v544_v27, 0.0 }
0x14ca   :  { %547 = vadd.xlane.f32.xlu1 %v546_v28 }
0x14e3   :  { %634 = vrot.lane.b32.xlu1 %v968_v31, %s1033_s24 }
0x151a   :  { %v726_v42 = vpop.permute.xlu2 %725 }
0x151b   :  { %v728_v53 = vsel %vm37_vm5, %v726_v42, 0.0 }
0x152c   :  { %v464_v32 = vpop.permute.xlu0 %463 }
0x152d   :  { %466 = vst.msk [vmem:[#allocation4 + $0x3] sm:$0x1] %vm37_vm5, %v464_v32 }
0x153d   :  { %v548_v13 = vpop.xlane.xlu1 %547 }
0x153e   :  { %969 = vlog2.f32 %v548_v13 }
0x153f   :  { %971 = vpow2.f32 %v813_v37 }
0x1544   :  { %v970_v34 = vpop.eup %969 }
0x1545   :  { %v550_v47 = vmul.f32 0.6931472, %v970_v34  ;;  %v972_v39 = vpop.eup %971 }
0x1547   :  { %v551_v36 = vadd.f32 %v550_v47, %v538_v7 }
0x1549   :  { %v552_v38 = vsub.f32 %v1176_v46, %v551_v36 }
0x154b   :  { %554 = vrot.lane.b32.xlu0 %v552_v38, %s1033_s24 }
0x1553   :  { %816 = vrot.lane.b32.xlu0 %v972_v39, %s1033_s24 }
0x1555   :  { %v635_v40 = vpop.permute.xlu1 %634 }
0x1556   :  { %v637_v10 = vsel %vm37_vm5, %v635_v40, 0.0 }
0x1557   :  { %638 = vadd.xlane.f32.xlu2 %v637_v10 }
0x15bd   :  { %v555_v41 = vpop.permute.xlu0 %554 }
0x15be   :  { %557 = vst.msk [vmem:[#allocation4 + $0x4] sm:$0x1] %vm37_vm5, %v555_v41 }
0x15c5   :  { %v817_v43 = vpop.permute.xlu0 %816 }
0x15c6   :  { %v819_v44 = vsel %vm37_vm5, %v817_v43, 0.0 }
0x15c7   :  { %820 = vadd.xlane.f32.xlu1 %v819_v44 }
0x15ca   :  { %v639_v48 = vpop.xlane.xlu2 %638 }
0x15cb   :  { %973 = vlog2.f32 %v639_v48 }
0x15d1   :  { %v974_v46 = vpop.eup %973 }
0x15d2   :  { %v641_v49 = vmul.f32 0.6931472, %v974_v46 }
0x15d4   :  { %v642_v51 = vadd.f32 %v641_v49, %v629_v21 }
0x15d6   :  { %v643_v52 = vsub.f32 %v1187_v17, %v642_v51 }
0x15d8   :  { %645 = vrot.lane.b32.xlu0 %v643_v52, %s1033_s24 }
0x15e0   :  { %831 = vrot.lane.b32.xlu1 %v1210_v22, %s1032_s23 }
0x1602   :  { %729 = vadd.xlane.f32.xlu0 %v728_v53 }
0x163a   :  { %v821_v54 = vpop.xlane.xlu1 %820 }
0x163b   :  { %975 = vlog2.f32 %v821_v54 }
0x1641   :  { %v976_v55 = vpop.eup %975 }
0x1642   :  { %v823_v56 = vmul.f32 0.6931472, %v976_v55 }
0x1644   :  { %v824_v57 = vadd.f32 %v823_v56, %v811_v26 }
0x1646   :  { %v825_v58 = vsub.f32 %v1221_v33, %v824_v57 }
0x1648   :  { %827 = vrot.lane.b32.xlu0 %v825_v58, %s1033_s24 }
0x164a   :  { %v646_v59 = vpop.permute.xlu0 %645 }
0x164b   :  { %648 = vst.msk [vmem:[#allocation4 + $0x5] sm:$0x1] %vm37_vm5, %v646_v59 }
0x1652   :  { %v832_v17 = vpop.permute.xlu1 %831 }
0x1653   :  { %835 = vst.msk [vmem:[#allocation2 - $0x7] sm:$0x80] %vm834_vm0, %v832_v17 }
0x1654   :  { %840 = vst.msk [vmem:[#allocation6 - $0x7] sm:$0x80] %vm834_vm0, %v832_v17 }
0x1655   :  { %862 = dma.vmem_to_hbm [thread:$0]  %s858_s25, 16, %s860_s28, [#allocation7]  }
0x1675   :  { %v730_v22 = vpop.xlane.xlu0 %729 }
0x1676   :  { %977 = vlog2.f32 %v730_v22 }
0x167c   :  { %v978_v33 = vpop.eup %977 }
0x167d   :  { %v732_v60 = vmul.f32 0.6931472, %v978_v33 }
0x167f   :  { %v733_v61 = vadd.f32 %v732_v60, %v1254_v19 }
0x1681   :  { %v734_v62 = vsub.f32 %v1198_v50, %v733_v61 }
0x1683   :  { %736 = vrot.lane.b32.xlu2 %v734_v62, %s1033_s24 }
0x16ba   :  { %v828_v63 = vpop.permute.xlu0 %827 }
0x16bb   :  { %830 = vst.msk [vmem:[#allocation4 + $0x7] sm:$0x1] %vm37_vm5, %v828_v63 }
0x16dd   :  { %v737_v0 = vpop.permute.xlu2 %736 }
0x16de   :  { %739 = vst.msk [vmem:[#allocation4 + $0x6] sm:$0x1] %vm37_vm5, %v737_v0 }
0x16df   :  { %851 = dma.vmem_to_hbm [thread:$0]  %s847_s30, 128, %s849_s9, [#allocation5]  }
0x16e0   :  { %1027 = dma.done.wait [#allocation5], 128  }
0x16e1   :  { %1028 = vsyncadd [#allocation5], 4294967168 }
0x16e2   :  { %1029 = dma.done.wait [#allocation7], 16  }
0x16e3   :  { %1030 = vsyncadd [#allocation7], 4294967280 }
0x16e4   :  { %871 = vsyncpa [#allocation5], 1 }
0x16e5   :  { %872 = vsyncpa [#allocation7], 1 }

</bundles_post_ra>
